<compile_context>
chip_gen: v7x
topology: tpu7x:2x2x1
jax: 0.10.0
libtpu: 0.0.40
codegen_flags: <defaults>
</compile_context>

<pallas_src>
import functools

import numpy as np

import jax
import jax.numpy as jnp
from jax import lax
from jax.experimental import pallas as pl
from jax.experimental.pallas import tpu as pltpu


def _pit_pool_kernel(x_ref, colsel_ref, wcol_ref, bcol_ref, cls_ref,
                     fcw_ref, fcb_ref, conv_o_ref, cls_o_ref,
                     *, kk, mult, hw_out, tp):
    # Per grid step (bb, g):
    #   x_ref      : (Bt, G, S)             S = H*W, contiguous rows
    #   colsel_ref : (S, kk*Tp)             static 0/1 tap selector (zero pad folded in)
    #   wcol_ref   : (1, kk*mult, Bt*G, 1)  per-(tap, multiplier) weight columns
    #   bcol_ref   : (1, mult, Bt*G, 1)     bias columns
    #   cls_ref    : (Bt, 1, C_in)
    #   fcw_ref    : (C_out, C_in)          untransposed Linear weight
    #   fcb_ref    : (1, C_out)
    #   conv_o_ref : (Bt, G, mult*HWo)      == NCHW memory order
    #   cls_o_ref  : (Bt, 1, C_out)
    bt, g_ch, s = x_ref.shape
    rows = bt * g_ch

    # --- depthwise strided conv: ONE MXU matmul gathers every (kh,kw,y,x) tap ---
    xf = x_ref[...].reshape(rows, s)                           # free: merge leading dims
    sel = jnp.dot(xf, colsel_ref[...],
                  preferred_element_type=jnp.float32)          # (Bt*G, kk*Tp)

    # --- tap reduction: kk*mult VPU FMAs; every tap slice starts 128-lane aligned ---
    pieces = []
    for j in range(mult):
        acc = jnp.broadcast_to(bcol_ref[0, j], (rows, tp))     # bias-initialised
        for t in range(kk):
            acc = acc + wcol_ref[0, t * mult + j] * sel[:, t * tp:(t + 1) * tp]
        pieces.append(acc[:, :hw_out])
    out_val = pieces[0] if mult == 1 else jnp.concatenate(pieces, axis=-1)
    conv_o_ref[...] = out_val.reshape(bt, g_ch, mult * hw_out).astype(conv_o_ref.dtype)

    # --- cls-token Linear (fc), fused.  Recomputed/stored identically at every
    #     channel-group step, so both grid axes are safely "parallel". ---
    cls_in = cls_ref[...].reshape(bt, cls_ref.shape[-1])       # (Bt, C_in)
    cls_y = lax.dot_general(cls_in, fcw_ref[...],
                            dimension_numbers=(((1,), (1,)), ((), ())),
                            preferred_element_type=jnp.float32)  # (Bt, C_out)
    cls_o_ref[...] = (cls_y + fcb_ref[...]).reshape(cls_o_ref.shape).astype(cls_o_ref.dtype)


@functools.lru_cache(maxsize=None)
def _build_tap_selector(H, W, H_out, W_out, stride, k, pad, tp):
    """Static 0/1 matrix (H*W, k*k*tp).  Column [tap*tp + y*W_out + x] selects
    input pixel (stride*y + kh - pad, stride*x + kw - pad); out-of-range taps
    remain all-zero (implements the conv's zero padding).  Built with NumPy so
    it is a baked constant (no per-call XLA prologue)."""
    kk = k * k
    kh = np.arange(k)[:, None, None, None]
    kw = np.arange(k)[None, :, None, None]
    yy = np.arange(H_out)[None, None, :, None]
    xx = np.arange(W_out)[None, None, None, :]
    sy = stride * yy + kh - pad
    sx = stride * xx + kw - pad
    valid = (sy >= 0) & (sy < H) & (sx >= 0) & (sx < W)
    src = sy * W + sx                               # (k, k, H_out, W_out)
    dst = (kh * k + kw) * tp + yy * W_out + xx      # (k, k, H_out, W_out)
    src, dst, valid = np.broadcast_arrays(src, dst, valid)
    sel = np.zeros((H * W, kk * tp), np.float32)
    sel[src[valid], dst[valid]] = 1.0
    return sel


def conv_head_pooling_forward(x, cls_token, conv_w, conv_b, fc_w, fc_b, stride):
    """x: (B, C_in, H, W) NCHW; cls_token: (B, 1, C_in);
    conv_w: (C_out, 1, k, k) depthwise weight (groups=C_in); fc_w: (C_out, C_in).
    Returns (conv_out (B, C_out, H_out, W_out), cls_out (B, 1, C_out))."""
    B, C_in, H, W = x.shape
    C_out = conv_w.shape[0]
    assert C_out % C_in == 0, "grouped conv requires out_feature % in_feature == 0"
    mult = C_out // C_in
    k = stride + 1
    p = stride // 2
    H_out = (H + 2 * p - k) // stride + 1
    W_out = (W + 2 * p - k) // stride + 1
    S = H * W
    HWo = H_out * W_out
    Tp = ((HWo + 127) // 128) * 128            # 128-lane-aligned tap block width
    kk = k * k
    f32 = jnp.float32

    # Channel-group size G: G == C_in (single group) or G % 8 == 0 (sublane rule).
    if C_in <= 32 or C_in % 8 != 0:
        G = C_in
    elif C_in % 32 == 0:
        G = 32
    elif C_in % 16 == 0:
        G = 16
    else:
        G = 8
    NG = C_in // G

    # Batch block: biggest divisor of B up to 16 (amortise per-step overhead).
    Bt = 1
    for cand in range(min(B, 16), 0, -1):
        if B % cand == 0:
            Bt = cand
            break
    NB = B // Bt

    # Static selector (NumPy, shape-only) and tiny weight/bias column repacks
    # (jnp so the wrapper stays jit-compatible; these are a few vreg-sized ops).
    colsel = jnp.asarray(_build_tap_selector(H, W, H_out, W_out, stride, k, p, Tp))

    w4 = conv_w.astype(f32).reshape(NG, G, mult, kk)            # [g, c, j, tap]
    wcol = jnp.transpose(w4, (0, 3, 2, 1))                      # [g, tap, j, c]
    wcol = jnp.tile(wcol[:, :, :, None, :], (1, 1, 1, Bt, 1))   # [g, tap, j, b, c]
    wcol = wcol.reshape(NG, kk * mult, Bt * G, 1)

    b3 = conv_b.astype(f32).reshape(NG, G, mult)                # [g, c, j]
    bcol = jnp.transpose(b3, (0, 2, 1))                         # [g, j, c]
    bcol = jnp.tile(bcol[:, :, None, :], (1, 1, Bt, 1)).reshape(NG, mult, Bt * G, 1)

    x3 = x.astype(f32).reshape(B, C_in, S)                      # free reshape, no pad
    cls3 = cls_token.astype(f32).reshape(B, 1, C_in)
    fcw = fc_w.astype(f32)                                      # (C_out, C_in)
    fcb = fc_b.astype(f32).reshape(1, C_out)

    # Explicit VMEM budget (v7x has only 64 MiB physical).
    est_bytes = 4 * (2 * (Bt * G * S + S * kk * Tp + kk * mult * Bt * G
                          + mult * Bt * G + Bt * C_in + C_out * C_in + C_out
                          + Bt * G * mult * HWo + Bt * C_out)
                     + 2 * (Bt * G * kk * Tp))                  # live intermediates
    vmem_limit = int(min(64 << 20, max(32 << 20, 2 * est_bytes)))

    kernel = functools.partial(_pit_pool_kernel, kk=kk, mult=mult,
                               hw_out=HWo, tp=Tp)

    conv_out, cls_out = pl.pallas_call(
        kernel,
        out_shape=(
            jax.ShapeDtypeStruct((B, C_in, mult * HWo), f32),   # == NCHW memory order
            jax.ShapeDtypeStruct((B, 1, C_out), f32),
        ),
        grid=(NB, NG),
        in_specs=[
            pl.BlockSpec((Bt, G, S), lambda bb, g: (bb, g, 0)),
            pl.BlockSpec((S, kk * Tp), lambda bb, g: (0, 0)),
            pl.BlockSpec((1, kk * mult, Bt * G, 1), lambda bb, g: (g, 0, 0, 0)),
            pl.BlockSpec((1, mult, Bt * G, 1), lambda bb, g: (g, 0, 0, 0)),
            pl.BlockSpec((Bt, 1, C_in), lambda bb, g: (bb, 0, 0)),
            pl.BlockSpec((C_out, C_in), lambda bb, g: (0, 0)),
            pl.BlockSpec((1, C_out), lambda bb, g: (0, 0)),
        ],
        out_specs=(
            pl.BlockSpec((Bt, G, mult * HWo), lambda bb, g: (bb, g, 0)),
            pl.BlockSpec((Bt, 1, C_out), lambda bb, g: (bb, 0, 0)),
        ),
        compiler_params=pltpu.CompilerParams(
            dimension_semantics=("parallel", "parallel"),
            vmem_limit_bytes=vmem_limit),
    )(x3, colsel, wcol, bcol, cls3, fcw, fcb)

    return conv_out.reshape(B, C_out, H_out, W_out), cls_out


if __name__ == "__main__":
    key = jax.random.PRNGKey(0)
    k1, k2, k3, k4, k5, k6 = jax.random.split(key, 6)

    B, C_in, H, W = 2, 4, 16, 16
    stride = 2
    C_out = 2 * C_in            # typical PiT pooling: doubles the embed dim
    ksz = stride + 1

    x = jax.random.normal(k1, (B, C_in, H, W), jnp.float32)
    cls_token = jax.random.normal(k2, (B, 1, C_in), jnp.float32)
    conv_w = 0.1 * jax.random.normal(k3, (C_out, 1, ksz, ksz), jnp.float32)
    conv_b = 0.1 * jax.random.normal(k4, (C_out,), jnp.float32)
    fc_w = 0.1 * jax.random.normal(k5, (C_out, C_in), jnp.float32)
    fc_b = 0.1 * jax.random.normal(k6, (C_out,), jnp.float32)

    conv_out, cls_out = conv_head_pooling_forward(
        x, cls_token, conv_w, conv_b, fc_w, fc_b, stride)
    jax.block_until_ready((conv_out, cls_out))

    # pure-JAX reference (same semantics as the PyTorch module)
    p = stride // 2
    ref_conv = lax.conv_general_dilated(
        x, conv_w, window_strides=(stride, stride),
        padding=((p, p), (p, p)),
        dimension_numbers=("NCHW", "OIHW", "NCHW"),
        feature_group_count=C_in) + conv_b[None, :, None, None]
    ref_cls = jnp.einsum("bsc,oc->bso", cls_token, fc_w) + fc_b

    assert conv_out.shape == ref_conv.shape
    assert cls_out.shape == ref_cls.shape
    assert jnp.allclose(conv_out, ref_conv, atol=1e-4, rtol=1e-4)
    assert jnp.allclose(cls_out, ref_cls, atol=1e-4, rtol=1e-4)
    print("KERNEL_OK")
</pallas_src>

<mosaic_0001>
module attributes {stable_mosaic.version = 11 : i64} {
  func.func @_pit_pool_kernel(%arg0: i32, %arg1: i32, %arg2: memref<2x4x256xf32, #tpu.memory_space<vmem>>, %arg3: memref<256x1152xf32, #tpu.memory_space<vmem>>, %arg4: memref<1x18x8x1xf32, #tpu.memory_space<vmem>>, %arg5: memref<1x2x8x1xf32, #tpu.memory_space<vmem>>, %arg6: memref<2x1x4xf32, #tpu.memory_space<vmem>>, %arg7: memref<8x4xf32, #tpu.memory_space<vmem>>, %arg8: memref<1x8xf32, #tpu.memory_space<vmem>>, %arg9: memref<2x4x128xf32, #tpu.memory_space<vmem>>, %arg10: memref<2x1x8xf32, #tpu.memory_space<vmem>>) attributes {dimension_semantics = [#tpu.dimension_semantics<parallel>, #tpu.dimension_semantics<parallel>], iteration_bounds = array<i64: 1, 1>, scalar_prefetch = 0 : i64, scratch_operands = 0 : i64, tpu.core_type = #tpu.core_type<tc>, window_params = [{transform_indices = @transform_0, window_bounds = array<i64: 2, 4, 256>}, {pipeline_mode = #tpu.pipeline_mode<synchronous>, transform_indices = @transform_1, window_bounds = array<i64: 256, 1152>}, {transform_indices = @transform_2, window_bounds = array<i64: 1, 18, 8, 1>}, {transform_indices = @transform_3, window_bounds = array<i64: 1, 2, 8, 1>}, {transform_indices = @transform_4, window_bounds = array<i64: 2, 1, 4>}, {pipeline_mode = #tpu.pipeline_mode<synchronous>, transform_indices = @transform_5, window_bounds = array<i64: 8, 4>}, {pipeline_mode = #tpu.pipeline_mode<synchronous>, transform_indices = @transform_6, window_bounds = array<i64: 1, 8>}, {transform_indices = @transform_7, window_bounds = array<i64: 2, 4, 128>}, {transform_indices = @transform_8, window_bounds = array<i64: 2, 1, 8>}]} {
    %c0 = arith.constant 0 : index
    %c0_0 = arith.constant 0 : index
    %c0_1 = arith.constant 0 : index
    %0 = vector.load %arg2[%c0, %c0_0, %c0_1] : memref<2x4x256xf32, #tpu.memory_space<vmem>>, vector<2x4x256xf32>
    %1 = vector.shape_cast %0 : vector<2x4x256xf32> to vector<8x256xf32>
    %c0_2 = arith.constant 0 : index
    %c0_3 = arith.constant 0 : index
    %2 = vector.load %arg3[%c0_2, %c0_3] : memref<256x1152xf32, #tpu.memory_space<vmem>>, vector<256x1152xf32>
    %cst = arith.constant dense<0.000000e+00> : vector<8x1152xf32>
    %3 = tpu.matmul %1, %2, %cst {dimension_numbers = #tpu.dot_dimension_numbers<[1], [0], [0], [1], [0, 0, 1, 1], [], []>} : vector<8x256xf32>, vector<256x1152xf32>, vector<8x1152xf32> -> vector<8x1152xf32>
    %c0_4 = arith.constant 0 : index
    %c0_5 = arith.constant 0 : index
    %c0_6 = arith.constant 0 : index
    %c0_7 = arith.constant 0 : index
    %4 = vector.load %arg5[%c0_4, %c0_5, %c0_6, %c0_7] : memref<1x2x8x1xf32, #tpu.memory_space<vmem>>, vector<1x1x8x1xf32>
    %5 = vector.shape_cast %4 : vector<1x1x8x1xf32> to vector<8x1xf32>
    %6 = vector.shape_cast %5 : vector<8x1xf32> to vector<8x1xf32>
    %7 = vector.broadcast %6 : vector<8x1xf32> to vector<8x128xf32>
    %c0_8 = arith.constant 0 : index
    %c0_9 = arith.constant 0 : index
    %c0_10 = arith.constant 0 : index
    %c0_11 = arith.constant 0 : index
    %8 = vector.load %arg4[%c0_8, %c0_9, %c0_10, %c0_11] : memref<1x18x8x1xf32, #tpu.memory_space<vmem>>, vector<1x1x8x1xf32>
    %9 = vector.shape_cast %8 : vector<1x1x8x1xf32> to vector<8x1xf32>
    %10 = vector.extract_strided_slice %3 {offsets = [0, 0], sizes = [8, 128], strides = [1, 1]} : vector<8x1152xf32> to vector<8x128xf32>
    %11 = vector.broadcast %9 : vector<8x1xf32> to vector<8x128xf32>
    %12 = arith.mulf %11, %10 : vector<8x128xf32>
    %13 = arith.addf %7, %12 : vector<8x128xf32>
    %c0_12 = arith.constant 0 : index
    %c2 = arith.constant 2 : index
    %c0_13 = arith.constant 0 : index
    %c0_14 = arith.constant 0 : index
    %14 = vector.load %arg4[%c0_12, %c2, %c0_13, %c0_14] : memref<1x18x8x1xf32, #tpu.memory_space<vmem>>, vector<1x1x8x1xf32>
    %15 = vector.shape_cast %14 : vector<1x1x8x1xf32> to vector<8x1xf32>
    %16 = vector.extract_strided_slice %3 {offsets = [0, 128], sizes = [8, 128], strides = [1, 1]} : vector<8x1152xf32> to vector<8x128xf32>
    %17 = vector.broadcast %15 : vector<8x1xf32> to vector<8x128xf32>
    %18 = arith.mulf %17, %16 : vector<8x128xf32>
    %19 = arith.addf %13, %18 : vector<8x128xf32>
    %c0_15 = arith.constant 0 : index
    %c4 = arith.constant 4 : index
    %c0_16 = arith.constant 0 : index
    %c0_17 = arith.constant 0 : index
    %20 = vector.load %arg4[%c0_15, %c4, %c0_16, %c0_17] : memref<1x18x8x1xf32, #tpu.memory_space<vmem>>, vector<1x1x8x1xf32>
    %21 = vector.shape_cast %20 : vector<1x1x8x1xf32> to vector<8x1xf32>
    %22 = vector.extract_strided_slice %3 {offsets = [0, 256], sizes = [8, 128], strides = [1, 1]} : vector<8x1152xf32> to vector<8x128xf32>
    %23 = vector.broadcast %21 : vector<8x1xf32> to vector<8x128xf32>
    %24 = arith.mulf %23, %22 : vector<8x128xf32>
    %25 = arith.addf %19, %24 : vector<8x128xf32>
    %c0_18 = arith.constant 0 : index
    %c6 = arith.constant 6 : index
    %c0_19 = arith.constant 0 : index
    %c0_20 = arith.constant 0 : index
    %26 = vector.load %arg4[%c0_18, %c6, %c0_19, %c0_20] : memref<1x18x8x1xf32, #tpu.memory_space<vmem>>, vector<1x1x8x1xf32>
    %27 = vector.shape_cast %26 : vector<1x1x8x1xf32> to vector<8x1xf32>
    %28 = vector.extract_strided_slice %3 {offsets = [0, 384], sizes = [8, 128], strides = [1, 1]} : vector<8x1152xf32> to vector<8x128xf32>
    %29 = vector.broadcast %27 : vector<8x1xf32> to vector<8x128xf32>
    %30 = arith.mulf %29, %28 : vector<8x128xf32>
    %31 = arith.addf %25, %30 : vector<8x128xf32>
    %c0_21 = arith.constant 0 : index
    %c8 = arith.constant 8 : index
    %c0_22 = arith.constant 0 : index
    %c0_23 = arith.constant 0 : index
    %32 = vector.load %arg4[%c0_21, %c8, %c0_22, %c0_23] : memref<1x18x8x1xf32, #tpu.memory_space<vmem>>, vector<1x1x8x1xf32>
    %33 = vector.shape_cast %32 : vector<1x1x8x1xf32> to vector<8x1xf32>
    %34 = vector.extract_strided_slice %3 {offsets = [0, 512], sizes = [8, 128], strides = [1, 1]} : vector<8x1152xf32> to vector<8x128xf32>
    %35 = vector.broadcast %33 : vector<8x1xf32> to vector<8x128xf32>
    %36 = arith.mulf %35, %34 : vector<8x128xf32>
    %37 = arith.addf %31, %36 : vector<8x128xf32>
    %c0_24 = arith.constant 0 : index
    %c10 = arith.constant 10 : index
    %c0_25 = arith.constant 0 : index
    %c0_26 = arith.constant 0 : index
    %38 = vector.load %arg4[%c0_24, %c10, %c0_25, %c0_26] : memref<1x18x8x1xf32, #tpu.memory_space<vmem>>, vector<1x1x8x1xf32>
    %39 = vector.shape_cast %38 : vector<1x1x8x1xf32> to vector<8x1xf32>
    %40 = vector.extract_strided_slice %3 {offsets = [0, 640], sizes = [8, 128], strides = [1, 1]} : vector<8x1152xf32> to vector<8x128xf32>
    %41 = vector.broadcast %39 : vector<8x1xf32> to vector<8x128xf32>
    %42 = arith.mulf %41, %40 : vector<8x128xf32>
    %43 = arith.addf %37, %42 : vector<8x128xf32>
    %c0_27 = arith.constant 0 : index
    %c12 = arith.constant 12 : index
    %c0_28 = arith.constant 0 : index
    %c0_29 = arith.constant 0 : index
    %44 = vector.load %arg4[%c0_27, %c12, %c0_28, %c0_29] : memref<1x18x8x1xf32, #tpu.memory_space<vmem>>, vector<1x1x8x1xf32>
    %45 = vector.shape_cast %44 : vector<1x1x8x1xf32> to vector<8x1xf32>
    %46 = vector.extract_strided_slice %3 {offsets = [0, 768], sizes = [8, 128], strides = [1, 1]} : vector<8x1152xf32> to vector<8x128xf32>
    %47 = vector.broadcast %45 : vector<8x1xf32> to vector<8x128xf32>
    %48 = arith.mulf %47, %46 : vector<8x128xf32>
    %49 = arith.addf %43, %48 : vector<8x128xf32>
    %c0_30 = arith.constant 0 : index
    %c14 = arith.constant 14 : index
    %c0_31 = arith.constant 0 : index
    %c0_32 = arith.constant 0 : index
    %50 = vector.load %arg4[%c0_30, %c14, %c0_31, %c0_32] : memref<1x18x8x1xf32, #tpu.memory_space<vmem>>, vector<1x1x8x1xf32>
    %51 = vector.shape_cast %50 : vector<1x1x8x1xf32> to vector<8x1xf32>
    %52 = vector.extract_strided_slice %3 {offsets = [0, 896], sizes = [8, 128], strides = [1, 1]} : vector<8x1152xf32> to vector<8x128xf32>
    %53 = vector.broadcast %51 : vector<8x1xf32> to vector<8x128xf32>
    %54 = arith.mulf %53, %52 : vector<8x128xf32>
    %55 = arith.addf %49, %54 : vector<8x128xf32>
    %c0_33 = arith.constant 0 : index
    %c16 = arith.constant 16 : index
    %c0_34 = arith.constant 0 : index
    %c0_35 = arith.constant 0 : index
    %56 = vector.load %arg4[%c0_33, %c16, %c0_34, %c0_35] : memref<1x18x8x1xf32, #tpu.memory_space<vmem>>, vector<1x1x8x1xf32>
    %57 = vector.shape_cast %56 : vector<1x1x8x1xf32> to vector<8x1xf32>
    %58 = vector.extract_strided_slice %3 {offsets = [0, 1024], sizes = [8, 128], strides = [1, 1]} : vector<8x1152xf32> to vector<8x128xf32>
    %59 = vector.broadcast %57 : vector<8x1xf32> to vector<8x128xf32>
    %60 = arith.mulf %59, %58 : vector<8x128xf32>
    %61 = arith.addf %55, %60 : vector<8x128xf32>
    %62 = vector.extract_strided_slice %61 {offsets = [0, 0], sizes = [8, 64], strides = [1, 1]} : vector<8x128xf32> to vector<8x64xf32>
    %c0_36 = arith.constant 0 : index
    %c1 = arith.constant 1 : index
    %c0_37 = arith.constant 0 : index
    %c0_38 = arith.constant 0 : index
    %63 = vector.load %arg5[%c0_36, %c1, %c0_37, %c0_38] : memref<1x2x8x1xf32, #tpu.memory_space<vmem>>, vector<1x1x8x1xf32>
    %64 = vector.shape_cast %63 : vector<1x1x8x1xf32> to vector<8x1xf32>
    %65 = vector.shape_cast %64 : vector<8x1xf32> to vector<8x1xf32>
    %66 = vector.broadcast %65 : vector<8x1xf32> to vector<8x128xf32>
    %c0_39 = arith.constant 0 : index
    %c1_40 = arith.constant 1 : index
    %c0_41 = arith.constant 0 : index
    %c0_42 = arith.constant 0 : index
    %67 = vector.load %arg4[%c0_39, %c1_40, %c0_41, %c0_42] : memref<1x18x8x1xf32, #tpu.memory_space<vmem>>, vector<1x1x8x1xf32>
    %68 = vector.shape_cast %67 : vector<1x1x8x1xf32> to vector<8x1xf32>
    %69 = vector.extract_strided_slice %3 {offsets = [0, 0], sizes = [8, 128], strides = [1, 1]} : vector<8x1152xf32> to vector<8x128xf32>
    %70 = vector.broadcast %68 : vector<8x1xf32> to vector<8x128xf32>
    %71 = arith.mulf %70, %69 : vector<8x128xf32>
    %72 = arith.addf %66, %71 : vector<8x128xf32>
    %c0_43 = arith.constant 0 : index
    %c3 = arith.constant 3 : index
    %c0_44 = arith.constant 0 : index
    %c0_45 = arith.constant 0 : index
    %73 = vector.load %arg4[%c0_43, %c3, %c0_44, %c0_45] : memref<1x18x8x1xf32, #tpu.memory_space<vmem>>, vector<1x1x8x1xf32>
    %74 = vector.shape_cast %73 : vector<1x1x8x1xf32> to vector<8x1xf32>
    %75 = vector.extract_strided_slice %3 {offsets = [0, 128], sizes = [8, 128], strides = [1, 1]} : vector<8x1152xf32> to vector<8x128xf32>
    %76 = vector.broadcast %74 : vector<8x1xf32> to vector<8x128xf32>
    %77 = arith.mulf %76, %75 : vector<8x128xf32>
    %78 = arith.addf %72, %77 : vector<8x128xf32>
    %c0_46 = arith.constant 0 : index
    %c5 = arith.constant 5 : index
    %c0_47 = arith.constant 0 : index
    %c0_48 = arith.constant 0 : index
    %79 = vector.load %arg4[%c0_46, %c5, %c0_47, %c0_48] : memref<1x18x8x1xf32, #tpu.memory_space<vmem>>, vector<1x1x8x1xf32>
    %80 = vector.shape_cast %79 : vector<1x1x8x1xf32> to vector<8x1xf32>
    %81 = vector.extract_strided_slice %3 {offsets = [0, 256], sizes = [8, 128], strides = [1, 1]} : vector<8x1152xf32> to vector<8x128xf32>
    %82 = vector.broadcast %80 : vector<8x1xf32> to vector<8x128xf32>
    %83 = arith.mulf %82, %81 : vector<8x128xf32>
    %84 = arith.addf %78, %83 : vector<8x128xf32>
    %c0_49 = arith.constant 0 : index
    %c7 = arith.constant 7 : index
    %c0_50 = arith.constant 0 : index
    %c0_51 = arith.constant 0 : index
    %85 = vector.load %arg4[%c0_49, %c7, %c0_50, %c0_51] : memref<1x18x8x1xf32, #tpu.memory_space<vmem>>, vector<1x1x8x1xf32>
    %86 = vector.shape_cast %85 : vector<1x1x8x1xf32> to vector<8x1xf32>
    %87 = vector.extract_strided_slice %3 {offsets = [0, 384], sizes = [8, 128], strides = [1, 1]} : vector<8x1152xf32> to vector<8x128xf32>
    %88 = vector.broadcast %86 : vector<8x1xf32> to vector<8x128xf32>
    %89 = arith.mulf %88, %87 : vector<8x128xf32>
    %90 = arith.addf %84, %89 : vector<8x128xf32>
    %c0_52 = arith.constant 0 : index
    %c9 = arith.constant 9 : index
    %c0_53 = arith.constant 0 : index
    %c0_54 = arith.constant 0 : index
    %91 = vector.load %arg4[%c0_52, %c9, %c0_53, %c0_54] : memref<1x18x8x1xf32, #tpu.memory_space<vmem>>, vector<1x1x8x1xf32>
    %92 = vector.shape_cast %91 : vector<1x1x8x1xf32> to vector<8x1xf32>
    %93 = vector.extract_strided_slice %3 {offsets = [0, 512], sizes = [8, 128], strides = [1, 1]} : vector<8x1152xf32> to vector<8x128xf32>
    %94 = vector.broadcast %92 : vector<8x1xf32> to vector<8x128xf32>
    %95 = arith.mulf %94, %93 : vector<8x128xf32>
    %96 = arith.addf %90, %95 : vector<8x128xf32>
    %c0_55 = arith.constant 0 : index
    %c11 = arith.constant 11 : index
    %c0_56 = arith.constant 0 : index
    %c0_57 = arith.constant 0 : index
    %97 = vector.load %arg4[%c0_55, %c11, %c0_56, %c0_57] : memref<1x18x8x1xf32, #tpu.memory_space<vmem>>, vector<1x1x8x1xf32>
    %98 = vector.shape_cast %97 : vector<1x1x8x1xf32> to vector<8x1xf32>
    %99 = vector.extract_strided_slice %3 {offsets = [0, 640], sizes = [8, 128], strides = [1, 1]} : vector<8x1152xf32> to vector<8x128xf32>
    %100 = vector.broadcast %98 : vector<8x1xf32> to vector<8x128xf32>
    %101 = arith.mulf %100, %99 : vector<8x128xf32>
    %102 = arith.addf %96, %101 : vector<8x128xf32>
    %c0_58 = arith.constant 0 : index
    %c13 = arith.constant 13 : index
    %c0_59 = arith.constant 0 : index
    %c0_60 = arith.constant 0 : index
    %103 = vector.load %arg4[%c0_58, %c13, %c0_59, %c0_60] : memref<1x18x8x1xf32, #tpu.memory_space<vmem>>, vector<1x1x8x1xf32>
    %104 = vector.shape_cast %103 : vector<1x1x8x1xf32> to vector<8x1xf32>
    %105 = vector.extract_strided_slice %3 {offsets = [0, 768], sizes = [8, 128], strides = [1, 1]} : vector<8x1152xf32> to vector<8x128xf32>
    %106 = vector.broadcast %104 : vector<8x1xf32> to vector<8x128xf32>
    %107 = arith.mulf %106, %105 : vector<8x128xf32>
    %108 = arith.addf %102, %107 : vector<8x128xf32>
    %c0_61 = arith.constant 0 : index
    %c15 = arith.constant 15 : index
    %c0_62 = arith.constant 0 : index
    %c0_63 = arith.constant 0 : index
    %109 = vector.load %arg4[%c0_61, %c15, %c0_62, %c0_63] : memref<1x18x8x1xf32, #tpu.memory_space<vmem>>, vector<1x1x8x1xf32>
    %110 = vector.shape_cast %109 : vector<1x1x8x1xf32> to vector<8x1xf32>
    %111 = vector.extract_strided_slice %3 {offsets = [0, 896], sizes = [8, 128], strides = [1, 1]} : vector<8x1152xf32> to vector<8x128xf32>
    %112 = vector.broadcast %110 : vector<8x1xf32> to vector<8x128xf32>
    %113 = arith.mulf %112, %111 : vector<8x128xf32>
    %114 = arith.addf %108, %113 : vector<8x128xf32>
    %c0_64 = arith.constant 0 : index
    %c17 = arith.constant 17 : index
    %c0_65 = arith.constant 0 : index
    %c0_66 = arith.constant 0 : index
    %115 = vector.load %arg4[%c0_64, %c17, %c0_65, %c0_66] : memref<1x18x8x1xf32, #tpu.memory_space<vmem>>, vector<1x1x8x1xf32>
    %116 = vector.shape_cast %115 : vector<1x1x8x1xf32> to vector<8x1xf32>
    %117 = vector.extract_strided_slice %3 {offsets = [0, 1024], sizes = [8, 128], strides = [1, 1]} : vector<8x1152xf32> to vector<8x128xf32>
    %118 = vector.broadcast %116 : vector<8x1xf32> to vector<8x128xf32>
    %119 = arith.mulf %118, %117 : vector<8x128xf32>
    %120 = arith.addf %114, %119 : vector<8x128xf32>
    %121 = vector.extract_strided_slice %120 {offsets = [0, 0], sizes = [8, 64], strides = [1, 1]} : vector<8x128xf32> to vector<8x64xf32>
    %122 = tpu.concatenate %62, %121 in 1 : vector<8x64xf32>, vector<8x64xf32> -> vector<8x128xf32>
    %123 = vector.shape_cast %122 : vector<8x128xf32> to vector<2x4x128xf32>
    %c0_67 = arith.constant 0 : index
    %c0_68 = arith.constant 0 : index
    %c0_69 = arith.constant 0 : index
    %124 = vector.load %arg9[%c0_67, %c0_68, %c0_69] : memref<2x4x128xf32, #tpu.memory_space<vmem>>, vector<2x4x128xf32>
    tpu.vector_store %arg9[%c0_67, %c0_68, %c0_69], %123 {strides = array<i32>} : memref<2x4x128xf32, #tpu.memory_space<vmem>>, vector<2x4x128xf32>,
    %c0_70 = arith.constant 0 : index
    %c0_71 = arith.constant 0 : index
    %c0_72 = arith.constant 0 : index
    %125 = vector.load %arg6[%c0_70, %c0_71, %c0_72] : memref<2x1x4xf32, #tpu.memory_space<vmem>>, vector<2x1x4xf32>
    %126 = vector.shape_cast %125 : vector<2x1x4xf32> to vector<2x4xf32>
    %c0_73 = arith.constant 0 : index
    %c0_74 = arith.constant 0 : index
    %127 = vector.load %arg7[%c0_73, %c0_74] : memref<8x4xf32, #tpu.memory_space<vmem>>, vector<8x4xf32>
    %cst_75 = arith.constant dense<0.000000e+00> : vector<2x8xf32>
    %128 = tpu.matmul %126, %127, %cst_75 {dimension_numbers = #tpu.dot_dimension_numbers<[1], [1], [0], [0], [0, 0, 1, 0], [], []>} : vector<2x4xf32>, vector<8x4xf32>, vector<2x8xf32> -> vector<2x8xf32>
    %c0_76 = arith.constant 0 : index
    %c0_77 = arith.constant 0 : index
    %129 = vector.load %arg8[%c0_76, %c0_77] : memref<1x8xf32, #tpu.memory_space<vmem>>, vector<1x8xf32>
    %130 = vector.broadcast %129 : vector<1x8xf32> to vector<2x8xf32>
    %131 = arith.addf %128, %130 : vector<2x8xf32>
    %132 = vector.shape_cast %131 : vector<2x8xf32> to vector<2x1x8xf32>
    %c0_78 = arith.constant 0 : index
    %c0_79 = arith.constant 0 : index
    %c0_80 = arith.constant 0 : index
    %133 = vector.load %arg10[%c0_78, %c0_79, %c0_80] : memref<2x1x8xf32, #tpu.memory_space<vmem>>, vector<2x1x8xf32>
    tpu.vector_store %arg10[%c0_78, %c0_79, %c0_80], %132 {strides = array<i32>} : memref<2x1x8xf32, #tpu.memory_space<vmem>>, vector<2x1x8xf32>,
    return
  }
  func.func @transform_0(%arg0: i32, %arg1: i32) -> (i32, i32, i32) {
    %c0_i32 = arith.constant 0 : i32
    %c0_i32_0 = arith.constant 0 : i32
    return %arg0, %arg1, %c0_i32 : i32, i32, i32
  }
  func.func @transform_1(%arg0: i32, %arg1: i32) -> (i32, i32) {
    %c0_i32 = arith.constant 0 : i32
    %c0_i32_0 = arith.constant 0 : i32
    %c0_i32_1 = arith.constant 0 : i32
    return %c0_i32, %c0_i32_0 : i32, i32
  }
  func.func @transform_2(%arg0: i32, %arg1: i32) -> (i32, i32, i32, i32) {
    %c0_i32 = arith.constant 0 : i32
    %c0_i32_0 = arith.constant 0 : i32
    %c0_i32_1 = arith.constant 0 : i32
    %c0_i32_2 = arith.constant 0 : i32
    return %arg1, %c0_i32, %c0_i32_0, %c0_i32_1 : i32, i32, i32, i32
  }
  func.func @transform_3(%arg0: i32, %arg1: i32) -> (i32, i32, i32, i32) {
    %c0_i32 = arith.constant 0 : i32
    %c0_i32_0 = arith.constant 0 : i32
    %c0_i32_1 = arith.constant 0 : i32
    %c0_i32_2 = arith.constant 0 : i32
    return %arg1, %c0_i32, %c0_i32_0, %c0_i32_1 : i32, i32, i32, i32
  }
  func.func @transform_4(%arg0: i32, %arg1: i32) -> (i32, i32, i32) {
    %c0_i32 = arith.constant 0 : i32
    %c0_i32_0 = arith.constant 0 : i32
    %c0_i32_1 = arith.constant 0 : i32
    return %arg0, %c0_i32, %c0_i32_0 : i32, i32, i32
  }
  func.func @transform_5(%arg0: i32, %arg1: i32) -> (i32, i32) {
    %c0_i32 = arith.constant 0 : i32
    %c0_i32_0 = arith.constant 0 : i32
    %c0_i32_1 = arith.constant 0 : i32
    return %c0_i32, %c0_i32_0 : i32, i32
  }
  func.func @transform_6(%arg0: i32, %arg1: i32) -> (i32, i32) {
    %c0_i32 = arith.constant 0 : i32
    %c0_i32_0 = arith.constant 0 : i32
    %c0_i32_1 = arith.constant 0 : i32
    return %c0_i32, %c0_i32_0 : i32, i32
  }
  func.func @transform_7(%arg0: i32, %arg1: i32) -> (i32, i32, i32) {
    %c0_i32 = arith.constant 0 : i32
    %c0_i32_0 = arith.constant 0 : i32
    return %arg0, %arg1, %c0_i32 : i32, i32, i32
  }
  func.func @transform_8(%arg0: i32, %arg1: i32) -> (i32, i32, i32) {
    %c0_i32 = arith.constant 0 : i32
    %c0_i32_0 = arith.constant 0 : i32
    %c0_i32_1 = arith.constant 0 : i32
    return %arg0, %c0_i32, %c0_i32_0 : i32, i32, i32
  }
}

</mosaic_0001>

<bundles_post_ra>
// kernel: tpu_custom_call.1
= control target key start
LH: loop header
LB: loop body
LE: loop exit
PB: predicated region body
PF: predicated region fallthrough
CT: control target
= control target key end

     0   :  { %14 = vsyncpa [#allocation3], 0  ;;  %s1830_s0 = inlined_call_operand.hbm [shape: f32[2,4,256], index: 0, kind: input, shape index: {}]   ;;  %s1831_s1 = inlined_call_operand.hbm [shape: f32[256,1152], index: 1, kind: input, shape index: {}]   ;;  %s1832_s2 = inlined_call_operand.vmem [shape: f32[1,18,8,1], index: 2, kind: input, shape index: {}]   ;;  %s1833_s3 = inlined_call_operand.vmem [shape: f32[1,2,8,1], index: 3, kind: input, shape index: {}]   ;;  %s1834_s4 = inlined_call_operand.hbm [shape: f32[2,1,4], index: 4, kind: input, shape index: {}]   ;;  %s1835_s5 = inlined_call_operand.vmem [shape: f32[8,4], index: 5, kind: input, shape index: {}]   ;;  %s1836_s6 = inlined_call_operand.hbm [shape: f32[1,8], index: 6, kind: input, shape index: {}]   ;;  %s1837_s7 = inlined_call_operand.hbm [shape: f32[2,4,128], index: 7, kind: output, shape index: {0}]   ;;  %s1838_s8 = inlined_call_operand.hbm [shape: f32[2,1,8], index: 8, kind: output, shape index: {1}]  }
   0x1   :  { %15 = vsyncpa [#allocation6], 0 }
   0x2   :  { %16 = vsyncpa [#allocation9], 0 }
   0x3   :  { %17 = vsyncpa [#allocation4], 0 }
   0x4   :  { %18 = vsyncpa [#allocation12], 0  ;;  %s1600_s27 = smov [#allocation5]   ;;  %s1458_s9 = scalar_lea.hbm %s1831_s1, 36864 }
   0x5   :  { %s36_s28 = sshll.u32 %s1600_s27, 4  ;;  %p1459_p0 = scmp.ne.s32.totalorder %s1831_s1, %s1458_s9  ;;  %s37_s28 = int_to_ptr.vmem [resolvable:$true] %s36_s28 }
   0x6   :  { %p1462_p1 = scmp.lt.u32.totalorder %s1458_s9, %s1831_s1 }
   0x8   :  { %p1464_p2 = pnand %p1462_p1, %p1459_p0 }
   0xa   :  { %1467 = shalt.err (!%p1464_p2)
}
   0xb   :  { %s1468_s14 = scalar_lea.vmem %s37_s28, 36864  ;;  %p1473_p4 = scmp.lt.s32.totalorder %s37_s28, %s37_s28 }
   0xc   :  { %p1469_p3 = scmp.ne.s32.totalorder %s37_s28, %s1468_s14  ;;  %p1474_p5 = scmp.lt.s32.totalorder %s1468_s14, %s1468_s14 }
   0xe   :  { %p1475_p6 = por %p1474_p5, %p1473_p4 }
  0x10   :  { %p1476_p7 = pnand %p1475_p6, %p1469_p3 }
  0x12   :  { %1479 = shalt.err (!%p1476_p7)
}
  0x13   :  { %s1601_s15 = smov 1152   ;;  %s1602_s16 = smov 72  }
  0x14   :  { %42 = dma.hbm_to_vmem [thread:$0]  %s1831_s1, 36864, %s37_s28, [#allocation6], %s1601_s15, %s1601_s15, %s1602_s16  }
  0x15   :  { %s1603_s19 = smov [#allocation2]   ;;  %s1480_s23 = scalar_lea.hbm %s1830_s0, 256 }
  0x16   :  { %s24_s20 = sshll.u32 %s1603_s19, 4  ;;  %p1481_p8 = scmp.ne.s32.totalorder %s1830_s0, %s1480_s23  ;;  %s25_s20 = int_to_ptr.vmem [resolvable:$true] %s24_s20 }
  0x17   :  { %p1484_p9 = scmp.lt.u32.totalorder %s1480_s23, %s1830_s0 }
  0x19   :  { %p1486_p10 = pnand %p1484_p9, %p1481_p8 }
  0x1b   :  { %1489 = shalt.err (!%p1486_p10)
}
  0x1c   :  { %s1490_s29 = scalar_lea.vmem %s25_s20, 256  ;;  %p1495_p12 = scmp.lt.s32.totalorder %s25_s20, %s25_s20 }
  0x1d   :  { %p1491_p11 = scmp.ne.s32.totalorder %s25_s20, %s1490_s29  ;;  %p1496_p13 = scmp.lt.s32.totalorder %s1490_s29, %s1490_s29 }
  0x1f   :  { %p1497_p0 = por %p1496_p13, %p1495_p12 }
  0x21   :  { %p1498_p1 = pnand %p1497_p0, %p1491_p11 }
  0x23   :  { %1501 = shalt.err (!%p1498_p1)
}
  0x24   :  { %s1604_s1 = smov 128   ;;  %s1605_s28 = smov 8  }
  0x25   :  { %30 = dma.hbm_to_vmem [thread:$0]  %s1830_s0, 256, %s25_s20, [#allocation3], %s1604_s1, %s1604_s1, %s1605_s28  }
  0x26   :  { %s1606_s10 = smov [#allocation7]   ;;  %s1502_s14 = scalar_lea.hbm %s1834_s4, 32 }
  0x27   :  { %s52_s11 = sshll.u32 %s1606_s10, 4  ;;  %p1503_p2 = scmp.ne.s32.totalorder %s1834_s4, %s1502_s14  ;;  %s53_s11 = int_to_ptr.vmem [resolvable:$true] %s52_s11 }
  0x28   :  { %p1506_p3 = scmp.lt.u32.totalorder %s1502_s14, %s1834_s4 }
  0x2a   :  { %p1508_p4 = pnand %p1506_p3, %p1503_p2 }
  0x2c   :  { %1511 = shalt.err (!%p1508_p4)
}
  0x2d   :  { %s1512_s19 = scalar_lea.vmem %s53_s11, 32  ;;  %p1517_p6 = scmp.lt.s32.totalorder %s53_s11, %s53_s11 }
  0x2e   :  { %p1513_p5 = scmp.ne.s32.totalorder %s53_s11, %s1512_s19  ;;  %p1518_p7 = scmp.lt.s32.totalorder %s1512_s19, %s1512_s19 }
  0x30   :  { %p1519_p8 = por %p1518_p7, %p1517_p6 }
  0x32   :  { %p1520_p9 = pnand %p1519_p8, %p1513_p5 }
  0x34   :  { %1523 = shalt.err (!%p1520_p9)
}
  0x35   :  { %s1607_s0 = smov 16   ;;  %s1608_s20 = smov 1  }
  0x36   :  { %58 = dma.hbm_to_vmem [thread:$0]  %s1834_s4, 32, %s53_s11, [#allocation6], %s1607_s0, %s1607_s0, %s1608_s20  }
  0x37   :  { %s1609_s23 = smov [#allocation8]   ;;  %s1524_s27 = scalar_lea.hbm %s1836_s6, 16 }
  0x38   :  { %s67_s24 = sshll.u32 %s1609_s23, 4  ;;  %p1525_p10 = scmp.ne.s32.totalorder %s1836_s6, %s1524_s27  ;;  %s68_s24 = int_to_ptr.vmem [resolvable:$true] %s67_s24 }
  0x39   :  { %p1528_p11 = scmp.lt.u32.totalorder %s1524_s27, %s1836_s6 }
  0x3b   :  { %p1530_p12 = pnand %p1528_p11, %p1525_p10 }
  0x3d   :  { %1533 = shalt.err (!%p1530_p12)
}
  0x3e   :  { %s1534_s9 = scalar_lea.vmem %s68_s24, 16  ;;  %s1538_s4 = scalar_lea.vmem %s68_s24, 32 }
  0x3f   :  { %p1535_p13 = scmp.ne.s32.totalorder %s68_s24, %s1534_s9  ;;  %p1539_p0 = scmp.lt.s32.totalorder %s68_s24, %s68_s24 }
  0x40   :  { %p1540_p1 = scmp.lt.s32.totalorder %s1538_s4, %s1534_s9 }
  0x42   :  { %p1541_p2 = por %p1540_p1, %p1539_p0 }
  0x44   :  { %p1542_p3 = pnand %p1541_p2, %p1535_p13 }
  0x46   :  { %1545 = shalt.err (!%p1542_p3)
}
  0x47   :  { %70 = dma.hbm_to_vmem [thread:$0]  %s1836_s6, 16, %s68_s24, [#allocation9]  }
  0x48   :  { %1590 = dma.done.wait [#allocation3], 256  }
  0x49   :  { %1591 = vsyncadd [#allocation3], 4294967040 }
  0x4a   :  { %1592 = dma.done.wait [#allocation6], 36896  }
  0x4b   :  { %1593 = vsyncadd [#allocation6], 4294930400 }
  0x4c   :  { %1594 = dma.done.wait [#allocation9], 16  }
  0x4d   :  { %1595 = vsyncadd [#allocation9], 4294967280  ;;  %v1610_v0 = vmov 0   ;;  %v86_v1 = vld [vmem:[#allocation5 + $0x8] sm:$0xff]  ;;  %v95_v2 = vld [vmem:[#allocation5 + $0x50] sm:$0xff]  ;;  %vm945_vm0 = vcmask 31744  }
  0x4e   :  { %1453 = vset.pattern.permute.xlu0 %v1610_v0  ;;  %1454 = vset.pattern.permute.xlu1 %v1610_v0  ;;  %v85_v3 = vld [vmem:[#allocation5] sm:$0xff]  ;;  %v1147_v4 = vpack.c.bf16 %v95_v2, %v86_v1  ;;  %v94_v5 = vld [vmem:[#allocation5 + $0x48] sm:$0xff]  ;;  %v104_v6 = vld [vmem:[#allocation5 + $0x98] sm:$0xff]  ;;  %vm1613_vm1 = vmmov 0   ;;  %vm1046_vm2 = vcmask 57344  }
  0x4f   :  { %v113_v7 = vld [vmem:[#allocation5 + $0xe0] sm:$0xff]  ;;  %v1149_v8 = vpack.c.bf16 %v94_v5, %v85_v3  ;;  %v88_v10 = vld [vmem:[#allocation5 + $0x18] sm:$0xff]  ;;  %v103_v12 = vld [vmem:[#allocation5 + $0x90] sm:$0xff] }
  0x50   :  { %v1151_v9 = vpack.c.bf16 %v113_v7, %v104_v6  ;;  %v97_v11 = vld [vmem:[#allocation5 + $0x60] sm:$0xff]  ;;  %1148 = vmatprep.subr.bf16.mxu0 %v1147_v4  ;;  %v112_v14 = vld [vmem:[#allocation5 + $0xd8] sm:$0xff]  ;;  %v87_v15 = vld [vmem:[#allocation5 + $0x10] sm:$0xff] }
  0x51   :  { %v1211_v13 = vpack.c.bf16 %v97_v11, %v88_v10  ;;  %v96_v16 = vld [vmem:[#allocation5 + $0x58] sm:$0xff]  ;;  %1150 = vmatpush1.bf16.msra.mxu0 %v1149_v8  ;;  %v1153_v17 = vpack.c.bf16 %v112_v14, %v103_v12  ;;  %v122_v19 = vld [vmem:[#allocation5 + $0x128] sm:$0xff]  ;;  %v131_v20 = vld [vmem:[#allocation5 + $0x170] sm:$0xff] }
  0x52   :  { %v1213_v18 = vpack.c.bf16 %v96_v16, %v87_v15  ;;  %v106_v21 = vld [vmem:[#allocation5 + $0xa8] sm:$0xff]  ;;  %1152 = vmatprep.subr.bf16.mxu0 %v1151_v9  ;;  %v1155_v22 = vpack.c.bf16 %v131_v20, %v122_v19  ;;  %v115_v23 = vld [vmem:[#allocation5 + $0xf0] sm:$0xff]  ;;  %v121_v24 = vld [vmem:[#allocation5 + $0x120] sm:$0xff] }
  0x53   :  { %1212 = vmatprep.subr.bf16.mxu1 %v1211_v13  ;;  %v130_v25 = vld [vmem:[#allocation5 + $0x168] sm:$0xff]  ;;  %v1215_v26 = vpack.c.bf16 %v115_v23, %v106_v21  ;;  %v105_v27 = vld [vmem:[#allocation5 + $0xa0] sm:$0xff]  ;;  %v140_v29 = vld [vmem:[#allocation5 + $0x1b8] sm:$0xff] }
  0x54   :  { %1214 = vmatpush1.bf16.msra.mxu1 %v1213_v18  ;;  %v114_v28 = vld [vmem:[#allocation5 + $0xe8] sm:$0xff]  ;;  %v149_v31 = vld [vmem:[#allocation5 + $0x200] sm:$0xff]  ;;  %v124_v32 = vld [vmem:[#allocation5 + $0x138] sm:$0xff]  ;;  %v1157_v34 = vpack.c.bf16 %v130_v25, %v121_v24 }
  0x55   :  { %v1217_v30 = vpack.c.bf16 %v114_v28, %v105_v27  ;;  %v133_v33 = vld [vmem:[#allocation5 + $0x180] sm:$0xff]  ;;  %1154 = vmatpush1.bf16.msra.mxu0 %v1153_v17  ;;  %1216 = vmatprep.subr.bf16.mxu1 %v1215_v26  ;;  %v139_v36 = vld [vmem:[#allocation5 + $0x1b0] sm:$0xff]  ;;  %v1159_v38 = vpack.c.bf16 %v149_v31, %v140_v29  ;;  %v148_v39 = vld [vmem:[#allocation5 + $0x1f8] sm:$0xff] }
  0x56   :  { %v1219_v35 = vpack.c.bf16 %v133_v33, %v124_v32  ;;  %v123_v37 = vld [vmem:[#allocation5 + $0x130] sm:$0xff]  ;;  %1156 = vmatprep.subr.bf16.mxu0 %v1155_v22  ;;  %v132_v40 = vld [vmem:[#allocation5 + $0x178] sm:$0xff]  ;;  %v158_v41 = vld [vmem:[#allocation5 + $0x248] sm:$0xff]  ;;  %v1161_v49 = vpack.c.bf16 %v148_v39, %v139_v36 }
  0x57   :  { %v1221_v42 = vpack.c.bf16 %v132_v40, %v123_v37  ;;  %v167_v43 = vld [vmem:[#allocation5 + $0x290] sm:$0xff]  ;;  %v142_v44 = vld [vmem:[#allocation5 + $0x1c8] sm:$0xff]  ;;  %v141_v47 = vld [vmem:[#allocation5 + $0x1c0] sm:$0xff] }
  0x58   :  { %1218 = vmatpush1.bf16.msra.mxu1 %v1217_v30  ;;  %v151_v45 = vld [vmem:[#allocation5 + $0x210] sm:$0xff]  ;;  %v150_v48 = vld [vmem:[#allocation5 + $0x208] sm:$0xff]  ;;  %v160_v50 = vld [vmem:[#allocation5 + $0x258] sm:$0xff]  ;;  %v1163_v51 = vpack.c.bf16 %v167_v43, %v158_v41 }
  0x59   :  { %1220 = vmatprep.subr.bf16.mxu1 %v1219_v35  ;;  %v1223_v46 = vpack.c.bf16 %v151_v45, %v142_v44  ;;  %1158 = vmatpush1.bf16.msra.mxu0 %v1157_v34  ;;  %v157_v52 = vld [vmem:[#allocation5 + $0x240] sm:$0xff]  ;;  %v166_v53 = vld [vmem:[#allocation5 + $0x288] sm:$0xff]  ;;  %v1225_v55 = vpack.c.bf16 %v150_v48, %v141_v47  ;;  %v176_v56 = vld [vmem:[#allocation5 + $0x2d8] sm:$0xff] }
  0x5a   :  { %1160 = vmatprep.subr.bf16.mxu0 %v1159_v38  ;;  %v169_v54 = vld [vmem:[#allocation5 + $0x2a0] sm:$0xff]  ;;  %v159_v59 = vld [vmem:[#allocation5 + $0x250] sm:$0xff]  ;;  %v168_v60 = vld [vmem:[#allocation5 + $0x298] sm:$0xff]  ;;  %v1165_v61 = vpack.c.bf16 %v166_v53, %v157_v52 }
  0x5b   :  { %v185_v57 = vld [vmem:[#allocation5 + $0x320] sm:$0xff]  ;;  %v1227_v58 = vpack.c.bf16 %v169_v54, %v160_v50  ;;  %v178_v62 = vld [vmem:[#allocation5 + $0x2e8] sm:$0xff]  ;;  %v187_v63 = vld [vmem:[#allocation5 + $0x330] sm:$0xff]  ;;  %v1229_v3 = vpack.c.bf16 %v168_v60, %v159_v59 }
  0x5c   :  { %1222 = vmatpush1.bf16.msra.mxu1 %v1221_v42  ;;  %v1167_v0 = vpack.c.bf16 %v185_v57, %v176_v56  ;;  %v175_v1 = vld [vmem:[#allocation5 + $0x2d0] sm:$0xff]  ;;  %v184_v2 = vld [vmem:[#allocation5 + $0x318] sm:$0xff]  ;;  %v194_v4 = vld [vmem:[#allocation5 + $0x368] sm:$0xff]  ;;  %v1231_v6 = vpack.c.bf16 %v187_v63, %v178_v62 }
  0x5d   :  { %1224 = vmatprep.subr.bf16.mxu1 %v1223_v46  ;;  %1162 = vmatpush1.bf16.msra.mxu0 %v1161_v49  ;;  %v203_v5 = vld [vmem:[#allocation5 + $0x3b0] sm:$0xff]  ;;  %v177_v7 = vld [vmem:[#allocation5 + $0x2e0] sm:$0xff]  ;;  %v186_v8 = vld [vmem:[#allocation5 + $0x328] sm:$0xff]  ;;  %v1169_v9 = vpack.c.bf16 %v184_v2, %v175_v1 }
  0x5e   :  { %1164 = vmatprep.subr.bf16.mxu0 %v1163_v51  ;;  %v196_v10 = vld [vmem:[#allocation5 + $0x378] sm:$0xff]  ;;  %v205_v11 = vld [vmem:[#allocation5 + $0x3c0] sm:$0xff]  ;;  %v1171_v12 = vpack.c.bf16 %v203_v5, %v194_v4  ;;  %v202_v14 = vld [vmem:[#allocation5 + $0x3a8] sm:$0xff]  ;;  %v1233_v15 = vpack.c.bf16 %v186_v8, %v177_v7 }
  0x5f   :  { %v193_v13 = vld [vmem:[#allocation5 + $0x360] sm:$0xff]  ;;  %v212_v16 = vld [vmem:[#allocation5 + $0x3f8] sm:$0xff]  ;;  %v1235_v18 = vpack.c.bf16 %v205_v11, %v196_v10  ;;  %v195_v19 = vld [vmem:[#allocation5 + $0x370] sm:$0xff] }
  0x60   :  { %1226 = vmatpush1.bf16.msra.mxu1 %v1225_v55  ;;  %v221_v17 = vld [vmem:[#allocation5 + $0x440] sm:$0xff]  ;;  %v204_v20 = vld [vmem:[#allocation5 + $0x3b8] sm:$0xff]  ;;  %v1173_v21 = vpack.c.bf16 %v202_v14, %v193_v13  ;;  %v214_v22 = vld [vmem:[#allocation5 + $0x408] sm:$0xff] }
  0x61   :  { %1228 = vmatprep.subr.bf16.mxu1 %v1227_v58  ;;  %1166 = vmatpush1.bf16.msra.mxu0 %v1165_v61  ;;  %v223_v23 = vld [vmem:[#allocation5 + $0x450] sm:$0xff]  ;;  %v1175_v24 = vpack.c.bf16 %v221_v17, %v212_v16  ;;  %v220_v26 = vld [vmem:[#allocation5 + $0x438] sm:$0xff]  ;;  %v1237_v27 = vpack.c.bf16 %v204_v20, %v195_v19  ;;  %v230_v28 = vld [vmem:[#allocation5 + $0x488] sm:$0xff] }
  0x62   :  { %1168 = vmatprep.subr.bf16.mxu0 %v1167_v0  ;;  %v211_v25 = vld [vmem:[#allocation5 + $0x3f0] sm:$0xff]  ;;  %v1239_v30 = vpack.c.bf16 %v223_v23, %v214_v22  ;;  %v213_v31 = vld [vmem:[#allocation5 + $0x400] sm:$0xff]  ;;  %v222_v32 = vld [vmem:[#allocation5 + $0x448] sm:$0xff] }
  0x63   :  { %v239_v29 = vld [vmem:[#allocation5 + $0x4d0] sm:$0xff]  ;;  %v1177_v33 = vpack.c.bf16 %v220_v26, %v211_v25  ;;  %v232_v34 = vld [vmem:[#allocation5 + $0x498] sm:$0xff]  ;;  %v241_v35 = vld [vmem:[#allocation5 + $0x4e0] sm:$0xff]  ;;  %v1241_v39 = vpack.c.bf16 %v222_v32, %v213_v31 }
  0x64   :  { %1230 = vmatpush1.bf16.msra.mxu1 %v1229_v3  ;;  %v1179_v36 = vpack.c.bf16 %v239_v29, %v230_v28  ;;  %v229_v37 = vld [vmem:[#allocation5 + $0x480] sm:$0xff]  ;;  %v238_v38 = vld [vmem:[#allocation5 + $0x4c8] sm:$0xff]  ;;  %v248_v40 = vld [vmem:[#allocation5 + $0x518] sm:$0xff]  ;;  %v1243_v42 = vpack.c.bf16 %v241_v35, %v232_v34 }
  0x65   :  { %1232 = vmatprep.subr.bf16.mxu1 %v1231_v6  ;;  %1170 = vmatpush1.bf16.msra.mxu0 %v1169_v9  ;;  %v257_v41 = vld [vmem:[#allocation5 + $0x560] sm:$0xff]  ;;  %v231_v43 = vld [vmem:[#allocation5 + $0x490] sm:$0xff]  ;;  %v240_v44 = vld [vmem:[#allocation5 + $0x4d8] sm:$0xff]  ;;  %v1181_v45 = vpack.c.bf16 %v238_v38, %v229_v37 }
  0x66   :  { %1172 = vmatprep.subr.bf16.mxu0 %v1171_v12  ;;  %v250_v46 = vld [vmem:[#allocation5 + $0x528] sm:$0xff]  ;;  %v259_v47 = vld [vmem:[#allocation5 + $0x570] sm:$0xff]  ;;  %v1183_v48 = vpack.c.bf16 %v257_v41, %v248_v40  ;;  %v256_v50 = vld [vmem:[#allocation5 + $0x558] sm:$0xff]  ;;  %v1245_v51 = vpack.c.bf16 %v240_v44, %v231_v43 }
  0x67   :  { %v247_v49 = vld [vmem:[#allocation5 + $0x510] sm:$0xff]  ;;  %v266_v52 = vld [vmem:[#allocation5 + $0x5a8] sm:$0xff]  ;;  %v1247_v54 = vpack.c.bf16 %v259_v47, %v250_v46  ;;  %v249_v55 = vld [vmem:[#allocation5 + $0x520] sm:$0xff] }
  0x68   :  { %1234 = vmatpush1.bf16.msra.mxu1 %v1233_v15  ;;  %v275_v53 = vld [vmem:[#allocation5 + $0x5f0] sm:$0xff]  ;;  %v258_v56 = vld [vmem:[#allocation5 + $0x568] sm:$0xff]  ;;  %v1185_v57 = vpack.c.bf16 %v256_v50, %v247_v49  ;;  %v268_v58 = vld [vmem:[#allocation5 + $0x5b8] sm:$0xff] }
  0x69   :  { %1236 = vmatprep.subr.bf16.mxu1 %v1235_v18  ;;  %1174 = vmatpush1.bf16.msra.mxu0 %v1173_v21  ;;  %v277_v59 = vld [vmem:[#allocation5 + $0x600] sm:$0xff]  ;;  %v1187_v60 = vpack.c.bf16 %v275_v53, %v266_v52  ;;  %v274_v62 = vld [vmem:[#allocation5 + $0x5e8] sm:$0xff]  ;;  %v1249_v63 = vpack.c.bf16 %v258_v56, %v249_v55  ;;  %v284_v0 = vld [vmem:[#allocation5 + $0x638] sm:$0xff] }
  0x6a   :  { %1176 = vmatprep.subr.bf16.mxu0 %v1175_v24  ;;  %v265_v61 = vld [vmem:[#allocation5 + $0x5a0] sm:$0xff]  ;;  %v1251_v2 = vpack.c.bf16 %v277_v59, %v268_v58  ;;  %v267_v3 = vld [vmem:[#allocation5 + $0x5b0] sm:$0xff]  ;;  %v276_v4 = vld [vmem:[#allocation5 + $0x5f8] sm:$0xff] }
  0x6b   :  { %v293_v1 = vld [vmem:[#allocation5 + $0x680] sm:$0xff]  ;;  %v1189_v5 = vpack.c.bf16 %v274_v62, %v265_v61  ;;  %v283_v6 = vld [vmem:[#allocation5 + $0x630] sm:$0xff]  ;;  %v286_v7 = vld [vmem:[#allocation5 + $0x648] sm:$0xff]  ;;  %v1253_v11 = vpack.c.bf16 %v276_v4, %v267_v3 }
  0x6c   :  { %1238 = vmatpush1.bf16.msra.mxu1 %v1237_v27  ;;  %v295_v8 = vld [vmem:[#allocation5 + $0x690] sm:$0xff]  ;;  %v1191_v9 = vpack.c.bf16 %v293_v1, %v284_v0  ;;  %v292_v10 = vld [vmem:[#allocation5 + $0x678] sm:$0xff]  ;;  %v302_v12 = vld [vmem:[#allocation5 + $0x6c8] sm:$0xff] }
  0x6d   :  { %1240 = vmatprep.subr.bf16.mxu1 %v1239_v30  ;;  %1178 = vmatpush1.bf16.msra.mxu0 %v1177_v33  ;;  %v311_v13 = vld [vmem:[#allocation5 + $0x710] sm:$0xff]  ;;  %v1255_v15 = vpack.c.bf16 %v295_v8, %v286_v7  ;;  %v285_v16 = vld [vmem:[#allocation5 + $0x640] sm:$0xff]  ;;  %v294_v17 = vld [vmem:[#allocation5 + $0x688] sm:$0xff]  ;;  %v1193_v18 = vpack.c.bf16 %v292_v10, %v283_v6 }
  0x6e   :  { %1180 = vmatprep.subr.bf16.mxu0 %v1179_v36  ;;  %v1714_v14 = vld [vmem:[#allocation2 + $0x4] ss:$8 sps:$4 sm:$0xff]   ;;  %v313_v20 = vld [vmem:[#allocation5 + $0x720] sm:$0xff]  ;;  %v1195_v21 = vpack.c.bf16 %v311_v13, %v302_v12  ;;  %v310_v23 = vld [vmem:[#allocation5 + $0x708] sm:$0xff]  ;;  %v1257_v24 = vpack.c.bf16 %v294_v17, %v285_v16 }
  0x6f   :  { %v304_v19 = vld [vmem:[#allocation5 + $0x6d8] sm:$0xff]  ;;  %443 = vmatprep.mubr.f32.mxu0 %v1714_v14  ;;  %v301_v22 = vld [vmem:[#allocation5 + $0x6c0] sm:$0xff]  ;;  %514 = vmatprep.mubr.f32.mxu1 %v1714_v14  ;;  %v303_v28 = vld [vmem:[#allocation5 + $0x6d0] sm:$0xff] }
  0x70   :  { %1242 = vmatpush1.bf16.msra.mxu1 %v1241_v39  ;;  %v320_v25 = vld [vmem:[#allocation5 + $0x758] sm:$0xff]  ;;  %v329_v26 = vld [vmem:[#allocation5 + $0x7a0] sm:$0xff]  ;;  %v1259_v27 = vpack.c.bf16 %v313_v20, %v304_v19  ;;  %v1197_v30 = vpack.c.bf16 %v310_v23, %v301_v22  ;;  %v322_v31 = vld [vmem:[#allocation5 + $0x768] sm:$0xff] }
  0x71   :  { %1244 = vmatprep.subr.bf16.mxu1 %v1243_v42  ;;  %1182 = vmatpush1.bf16.msra.mxu0 %v1181_v45  ;;  %v312_v29 = vld [vmem:[#allocation5 + $0x718] sm:$0xff]  ;;  %v331_v32 = vld [vmem:[#allocation5 + $0x7b0] sm:$0xff]  ;;  %v1199_v33 = vpack.c.bf16 %v329_v26, %v320_v25  ;;  %v338_v37 = vld [vmem:[#allocation5 + $0x7e8] sm:$0xff] }
  0x72   :  { %1184 = vmatprep.subr.bf16.mxu0 %v1183_v48  ;;  %v319_v34 = vld [vmem:[#allocation5 + $0x750] sm:$0xff]  ;;  %v328_v35 = vld [vmem:[#allocation5 + $0x798] sm:$0xff]  ;;  %v1261_v36 = vpack.c.bf16 %v312_v29, %v303_v28  ;;  %v1263_v39 = vpack.c.bf16 %v331_v32, %v322_v31  ;;  %v321_v40 = vld [vmem:[#allocation5 + $0x760] sm:$0xff] }
  0x73   :  { %v347_v38 = vld [vmem:[#allocation5 + $0x830] sm:$0xff]  ;;  %v330_v41 = vld [vmem:[#allocation5 + $0x7a8] sm:$0xff]  ;;  %v1201_v42 = vpack.c.bf16 %v328_v35, %v319_v34  ;;  %v340_v43 = vld [vmem:[#allocation5 + $0x7f8] sm:$0xff] }
  0x74   :  { %1246 = vmatpush1.bf16.msra.mxu1 %v1245_v51  ;;  %v349_v44 = vld [vmem:[#allocation5 + $0x840] sm:$0xff]  ;;  %v1203_v45 = vpack.c.bf16 %v347_v38, %v338_v37  ;;  %v346_v47 = vld [vmem:[#allocation5 + $0x828] sm:$0xff]  ;;  %v1265_v48 = vpack.c.bf16 %v330_v41, %v321_v40  ;;  %v356_v49 = vld [vmem:[#allocation5 + $0x878] sm:$0xff] }
  0x75   :  { %1248 = vmatprep.subr.bf16.mxu1 %v1247_v54  ;;  %1186 = vmatpush1.bf16.msra.mxu0 %v1185_v57  ;;  %v337_v46 = vld [vmem:[#allocation5 + $0x7e0] sm:$0xff]  ;;  %v1267_v51 = vpack.c.bf16 %v349_v44, %v340_v43  ;;  %v339_v52 = vld [vmem:[#allocation5 + $0x7f0] sm:$0xff]  ;;  %v348_v53 = vld [vmem:[#allocation5 + $0x838] sm:$0xff] }
  0x76   :  { %1188 = vmatprep.subr.bf16.mxu0 %v1187_v60  ;;  %v365_v50 = vld [vmem:[#allocation5 + $0x8c0] sm:$0xff]  ;;  %v1205_v54 = vpack.c.bf16 %v346_v47, %v337_v46  ;;  %v358_v55 = vld [vmem:[#allocation5 + $0x888] sm:$0xff]  ;;  %v367_v56 = vld [vmem:[#allocation5 + $0x8d0] sm:$0xff]  ;;  %v1269_v60 = vpack.c.bf16 %v348_v53, %v339_v52 }
  0x77   :  { %v1207_v57 = vpack.c.bf16 %v365_v50, %v356_v49  ;;  %v355_v58 = vld [vmem:[#allocation5 + $0x870] sm:$0xff]  ;;  %v364_v59 = vld [vmem:[#allocation5 + $0x8b8] sm:$0xff]  ;;  %v90_v61 = vld [vmem:[#allocation5 + $0x28] sm:$0xff] }
  0x78   :  { %1250 = vmatpush1.bf16.msra.mxu1 %v1249_v63  ;;  %v99_v62 = vld [vmem:[#allocation5 + $0x70] sm:$0xff]  ;;  %v1271_v63 = vpack.c.bf16 %v367_v56, %v358_v55  ;;  %v357_v0 = vld [vmem:[#allocation5 + $0x880] sm:$0xff]  ;;  %v366_v1 = vld [vmem:[#allocation5 + $0x8c8] sm:$0xff] }
  0x79   :  { %1252 = vmatprep.subr.bf16.mxu1 %v1251_v2  ;;  %1190 = vmatpush1.bf16.msra.mxu0 %v1189_v5  ;;  %v1209_v2 = vpack.c.bf16 %v364_v59, %v355_v58  ;;  %v92_v3 = vld [vmem:[#allocation5 + $0x38] sm:$0xff]  ;;  %v101_v4 = vld [vmem:[#allocation5 + $0x80] sm:$0xff]  ;;  %v1275_v5 = vpack.c.bf16 %v99_v62, %v90_v61  ;;  %v98_v7 = vld [vmem:[#allocation5 + $0x68] sm:$0xff]  ;;  %v1273_v8 = vpack.c.bf16 %v366_v1, %v357_v0 }
  0x7a   :  { %1192 = vmatprep.subr.bf16.mxu0 %v1191_v9  ;;  %v89_v6 = vld [vmem:[#allocation5 + $0x20] sm:$0xff]  ;;  %v108_v9 = vld [vmem:[#allocation5 + $0xb8] sm:$0xff]  ;;  %v1339_v12 = vpack.c.bf16 %v101_v4, %v92_v3  ;;  %v91_v13 = vld [vmem:[#allocation5 + $0x30] sm:$0xff] }
  0x7b   :  { %v117_v10 = vld [vmem:[#allocation5 + $0x100] sm:$0xff]  ;;  %v1277_v16 = vpack.c.bf16 %v98_v7, %v89_v6  ;;  %v110_v17 = vld [vmem:[#allocation5 + $0xc8] sm:$0xff]  ;;  %v107_v20 = vld [vmem:[#allocation5 + $0xb0] sm:$0xff] }
  0x7c   :  { %1254 = vmatpush1.bf16.msra.mxu1 %v1253_v11  ;;  %v1718_v11 = vld [vmem:[#allocation2] ss:$8 sps:$4 sm:$0xff]   ;;  %v1279_v19 = vpack.c.bf16 %v117_v10, %v108_v9  ;;  %v126_v23 = vld [vmem:[#allocation5 + $0x148] sm:$0xff]  ;;  %v109_v26 = vld [vmem:[#allocation5 + $0xc0] sm:$0xff] }
  0x7d   :  { %1256 = vmatprep.subr.bf16.mxu1 %v1255_v15  ;;  %1194 = vmatpush1.bf16.msra.mxu0 %v1193_v18  ;;  %v100_v15 = vld [vmem:[#allocation5 + $0x78] sm:$0xff]  ;;  %v119_v18 = vld [vmem:[#allocation5 + $0x110] sm:$0xff]  ;;  %v125_v32 = vld [vmem:[#allocation5 + $0x140] sm:$0xff] }
  0x7e   :  { %1196 = vmatprep.subr.bf16.mxu0 %v1195_v21  ;;  %v116_v21 = vld [vmem:[#allocation5 + $0xf8] sm:$0xff]  ;;  %v1341_v22 = vpack.c.bf16 %v100_v15, %v91_v13  ;;  %v1343_v25 = vpack.c.bf16 %v119_v18, %v110_v17  ;;  %v127_v38 = vld [vmem:[#allocation5 + $0x150] sm:$0xff]  ;;  %v146_v41 = vld [vmem:[#allocation5 + $0x1e8] sm:$0xff] }
  0x7f   :  { %v1281_v28 = vpack.c.bf16 %v116_v21, %v107_v20  ;;  %v128_v29 = vld [vmem:[#allocation5 + $0x158] sm:$0xff]  ;;  %v143_v44 = vld [vmem:[#allocation5 + $0x1d0] sm:$0xff]  ;;  %v162_v47 = vld [vmem:[#allocation5 + $0x268] sm:$0xff] }
  0x80   :  { %1258 = vmatpush1.bf16.msra.mxu1 %v1257_v24  ;;  %v135_v24 = vld [vmem:[#allocation5 + $0x190] sm:$0xff]  ;;  %v144_v35 = vld [vmem:[#allocation5 + $0x1d8] sm:$0xff]  ;;  %v145_v50 = vld [vmem:[#allocation5 + $0x1e0] sm:$0xff] }
  0x81   :  { %1260 = vmatprep.subr.bf16.mxu1 %v1259_v27  ;;  %1198 = vmatpush1.bf16.msra.mxu0 %v1197_v30  ;;  %v118_v27 = vld [vmem:[#allocation5 + $0x108] sm:$0xff]  ;;  %v137_v30 = vld [vmem:[#allocation5 + $0x1a0] sm:$0xff]  ;;  %v1283_v31 = vpack.c.bf16 %v135_v24, %v126_v23  ;;  %v164_v53 = vld [vmem:[#allocation5 + $0x278] sm:$0xff] }
  0x82   :  { %1200 = vmatprep.subr.bf16.mxu0 %v1199_v33  ;;  %v134_v33 = vld [vmem:[#allocation5 + $0x188] sm:$0xff]  ;;  %v1345_v34 = vpack.c.bf16 %v118_v27, %v109_v26  ;;  %v1347_v37 = vpack.c.bf16 %v137_v30, %v128_v29  ;;  %v161_v56 = vld [vmem:[#allocation5 + $0x260] sm:$0xff]  ;;  %v180_v59 = vld [vmem:[#allocation5 + $0x2f8] sm:$0xff] }
  0x83   :  { %v1285_v40 = vpack.c.bf16 %v134_v33, %v125_v32  ;;  %v163_v62 = vld [vmem:[#allocation5 + $0x270] sm:$0xff]  ;;  %v182_v1 = vld [vmem:[#allocation5 + $0x308] sm:$0xff]  ;;  %v181_v10 = vld [vmem:[#allocation5 + $0x300] sm:$0xff] }
  0x84   :  { %1262 = vmatpush1.bf16.msra.mxu1 %v1261_v36  ;;  %v153_v36 = vld [vmem:[#allocation5 + $0x220] sm:$0xff]  ;;  %v179_v4 = vld [vmem:[#allocation5 + $0x2f0] sm:$0xff]  ;;  %v198_v7 = vld [vmem:[#allocation5 + $0x388] sm:$0xff] }
  0x85   :  { %1264 = vmatprep.subr.bf16.mxu1 %v1263_v39  ;;  %1202 = vmatpush1.bf16.msra.mxu0 %v1201_v42  ;;  %v136_v39 = vld [vmem:[#allocation5 + $0x198] sm:$0xff]  ;;  %v155_v42 = vld [vmem:[#allocation5 + $0x230] sm:$0xff]  ;;  %v1287_v43 = vpack.c.bf16 %v153_v36, %v144_v35  ;;  %v206_v20 = vld [vmem:[#allocation5 + $0x3c8] sm:$0xff] }
  0x86   :  { %1204 = vmatprep.subr.bf16.mxu0 %v1203_v45  ;;  %v152_v45 = vld [vmem:[#allocation5 + $0x218] sm:$0xff]  ;;  %v1349_v46 = vpack.c.bf16 %v136_v39, %v127_v38  ;;  %v1351_v49 = vpack.c.bf16 %v155_v42, %v146_v41  ;;  %v1094_v21 = vld [vmem:[%s1832_s2 + $0x18] sm:$0xff]  ;;  %v225_v24 = vld [vmem:[#allocation5 + $0x460] sm:$0xff] }
  0x87   :  { %v1289_v52 = vpack.c.bf16 %v152_v45, %v143_v44  ;;  %v200_v15 = vld [vmem:[#allocation5 + $0x398] sm:$0xff]  ;;  %839 = vperm.xlu1 %1454, %v1094_v21   ;;  %v199_v26 = vld [vmem:[#allocation5 + $0x390] sm:$0xff]  ;;  %v218_v30 = vld [vmem:[#allocation5 + $0x428] sm:$0xff] }
  0x88   :  { %1266 = vmatpush1.bf16.msra.mxu1 %v1265_v48  ;;  %v171_v48 = vld [vmem:[#allocation5 + $0x2b0] sm:$0xff]  ;;  %v1093_v17 = vld [vmem:[%s1832_s2 + $0x8] sm:$0xff]  ;;  %v1096_v39 = vld [vmem:[%s1832_s2 + $0x38] sm:$0xff] }
  0x89   :  { %1268 = vmatprep.subr.bf16.mxu1 %v1267_v51  ;;  %1206 = vmatpush1.bf16.msra.mxu0 %v1205_v54  ;;  %v154_v51 = vld [vmem:[#allocation5 + $0x228] sm:$0xff]  ;;  %v173_v54 = vld [vmem:[#allocation5 + $0x2c0] sm:$0xff]  ;;  %v1291_v55 = vpack.c.bf16 %v171_v48, %v162_v47  ;;  %v216_v23 = vld [vmem:[#allocation5 + $0x418] sm:$0xff] }
  0x8a   :  { %1208 = vmatprep.subr.bf16.mxu0 %v1207_v57  ;;  %v170_v57 = vld [vmem:[#allocation5 + $0x2a8] sm:$0xff]  ;;  %v1353_v58 = vpack.c.bf16 %v154_v51, %v145_v50  ;;  %v1355_v61 = vpack.c.bf16 %v173_v54, %v164_v53  ;;  %830 = vperm.xlu0 %1453, %v1093_v17   ;;  %v208_v27 = vld [vmem:[#allocation5 + $0x3d8] sm:$0xff]  ;;  %v1303_v32 = vpack.c.bf16 %v225_v24, %v216_v23  ;;  %v215_v33 = vld [vmem:[#allocation5 + $0x410] sm:$0xff] }
  0x8b   :  { %v1293_v0 = vpack.c.bf16 %v170_v57, %v161_v56  ;;  %v1095_v35 = vld [vmem:[%s1832_s2 + $0x28] sm:$0xff]  ;;  %v1365_v36 = vpack.c.bf16 %v208_v27, %v199_v26  ;;  %v243_v38 = vld [vmem:[#allocation5 + $0x4f0] sm:$0xff]  ;;  %v217_v41 = vld [vmem:[#allocation5 + $0x420] sm:$0xff] }
  0x8c   :  { %1270 = vmatpush1.bf16.msra.mxu1 %v1269_v60  ;;  %v189_v60 = vld [vmem:[#allocation5 + $0x340] sm:$0xff]  ;;  %848 = vperm.xlu1 %1454, %v1095_v35   ;;  %v226_v42 = vld [vmem:[#allocation5 + $0x468] sm:$0xff]  ;;  %v236_v45 = vld [vmem:[#allocation5 + $0x4b8] sm:$0xff] }
  0x8d   :  { %1272 = vmatprep.subr.bf16.mxu1 %v1271_v63  ;;  %1210 = vmatpush1.bf16.msra.mxu0 %v1209_v2  ;;  %v172_v63 = vld [vmem:[#allocation5 + $0x2b8] sm:$0xff]  ;;  %v191_v2 = vld [vmem:[#allocation5 + $0x350] sm:$0xff]  ;;  %v1295_v3 = vpack.c.bf16 %v189_v60, %v180_v59  ;;  %v233_v48 = vld [vmem:[#allocation5 + $0x4a0] sm:$0xff]  ;;  %v1369_v50 = vpack.c.bf16 %v226_v42, %v217_v41 }
  0x8e   :  { %1276 = vmatprep.subr.bf16.mxu0 %v1275_v5  ;;  %v188_v5 = vld [vmem:[#allocation5 + $0x338] sm:$0xff]  ;;  %v1357_v6 = vpack.c.bf16 %v172_v63, %v163_v62  ;;  %v1359_v9 = vpack.c.bf16 %v191_v2, %v182_v1  ;;  %v1098_v53 = vld [vmem:[%s1832_s2 + $0x58] sm:$0xff]  ;;  %v263_v60 = vld [vmem:[#allocation5 + $0x590] sm:$0xff] }
  0x8f   :  { %v1297_v13 = vpack.c.bf16 %v188_v5, %v179_v4  ;;  %v252_v51 = vld [vmem:[#allocation5 + $0x538] sm:$0xff]  ;;  %v254_v59 = vld [vmem:[#allocation5 + $0x548] sm:$0xff]  ;;  %v251_v62 = vld [vmem:[#allocation5 + $0x530] sm:$0xff] }
  0x90   :  { %1274 = vmatpush1.bf16.msra.mxu1 %v1273_v8  ;;  %444 = vmatmul.mubr.f32.vlgmr.msra.gmra.mrb[0].mxu0 %v1718_v11  ;;  %v207_v8 = vld [vmem:[#allocation5 + $0x3d0] sm:$0xff]  ;;  %v244_v56 = vld [vmem:[#allocation5 + $0x4f8] sm:$0xff]  ;;  %v270_v1 = vld [vmem:[#allocation5 + $0x5c8] sm:$0xff]  ;;  %v1375_v4 = vpack.c.bf16 %v263_v60, %v254_v59 }
  0x91   :  { %1340 = vmatprep.subr.bf16.mxu1 %v1339_v12  ;;  %1278 = vmatpush1.bf16.msra.mxu0 %v1277_v16  ;;  %v190_v12 = vld [vmem:[#allocation5 + $0x348] sm:$0xff]  ;;  %v209_v16 = vld [vmem:[#allocation5 + $0x3e0] sm:$0xff]  ;;  %v1299_v18 = vpack.c.bf16 %v207_v8, %v198_v7  ;;  %v1099_v57 = vld [vmem:[%s1832_s2 + $0x68] sm:$0xff] }
  0x92   :  { %585 = vmatprep.mubr.f32.mxu0 %v1714_v14  ;;  %1280 = vmatprep.subr.bf16.mxu0 %v1279_v19  ;;  %v197_v19 = vld [vmem:[#allocation5 + $0x380] sm:$0xff]  ;;  %v260_v63 = vld [vmem:[#allocation5 + $0x578] sm:$0xff]  ;;  %v279_v2 = vld [vmem:[#allocation5 + $0x610] sm:$0xff] }
  0x93   :  { %515 = vmatmul.mubr.f32.vlgmr.msra.gmra.mrb[0].mxu1 %v1718_v11  ;;  %v1301_v29 = vpack.c.bf16 %v206_v20, %v197_v19  ;;  %v253_v5 = vld [vmem:[#allocation5 + $0x540] sm:$0xff]  ;;  %v1101_v7 = vld [vmem:[%s1832_s2 + $0x88] sm:$0xff]  ;;  %v1313_v8 = vpack.c.bf16 %v260_v63, %v251_v62  ;;  %v739_v19 = vld [vmem:[%s1832_s2] sm:$0xff] }
  0x94   :  { %1342 = vmatpush1.bf16.msra.mxu1 %v1341_v22  ;;  %656 = vmatprep.mubr.f32.mxu1 %v1714_v14  ;;  %v1361_v22 = vpack.c.bf16 %v190_v12, %v181_v10  ;;  %v281_v10 = vld [vmem:[#allocation5 + $0x620] sm:$0xff]  ;;  %v1315_v12 = vpack.c.bf16 %v279_v2, %v270_v1  ;;  %v288_v17 = vld [vmem:[#allocation5 + $0x658] sm:$0xff]  ;;  %v271_v21 = vld [vmem:[#allocation5 + $0x5d0] sm:$0xff] }
  0x95   :  { %1344 = vmatprep.subr.bf16.mxu1 %v1343_v25  ;;  %1282 = vmatpush1.bf16.msra.mxu0 %v1281_v28  ;;  %v1363_v25 = vpack.c.bf16 %v209_v16, %v200_v15  ;;  %v1092_v28 = vld [vmem:[%s1833_s3 + $0x8] sm:$0xff]  ;;  %v278_v15 = vld [vmem:[#allocation5 + $0x608] sm:$0xff]  ;;  %v733_v23 = vld [vmem:[%s1833_s3] sm:$0xff] }
  0x96   :  { %1284 = vmatprep.subr.bf16.mxu0 %v1283_v31  ;;  %v227_v31 = vld [vmem:[#allocation5 + $0x470] sm:$0xff]  ;;  %823 = vperm.xlu0 %1453, %v1092_v28   ;;  %v289_v35 = vld [vmem:[#allocation5 + $0x660] sm:$0xff]  ;;  %v342_v59 = vld [vmem:[#allocation5 + $0x808] sm:$0xff] }
  0x97   :  { %v299_v26 = vld [vmem:[#allocation5 + $0x6b0] sm:$0xff]  ;;  %v305_v42 = vld [vmem:[#allocation5 + $0x6e0] sm:$0xff] }
  0x98   :  { %1346 = vmatpush1.bf16.msra.mxu1 %v1345_v34  ;;  %v224_v34 = vld [vmem:[#allocation5 + $0x458] sm:$0xff]  ;;  %v287_v28 = vld [vmem:[#allocation5 + $0x650] sm:$0xff]  ;;  %v325_v63 = vld [vmem:[#allocation5 + $0x780] sm:$0xff] }
  0x99   :  { %1348 = vmatprep.subr.bf16.mxu1 %v1347_v37  ;;  %1286 = vmatpush1.bf16.msra.mxu0 %v1285_v40  ;;  %v234_v37 = vld [vmem:[#allocation5 + $0x4a8] sm:$0xff]  ;;  %v1367_v40 = vpack.c.bf16 %v227_v31, %v218_v30  ;;  %v1305_v44 = vpack.c.bf16 %v224_v34, %v215_v33  ;;  %v1084_v33 = vld [vmem:[%s1832_s2 + $0x10] sm:$0xff]  ;;  %v351_v60 = vld [vmem:[#allocation5 + $0x850] sm:$0xff] }
  0x9a   :  { %1288 = vmatprep.subr.bf16.mxu0 %v1287_v43  ;;  %v1097_v43 = vld [vmem:[%s1832_s2 + $0x48] sm:$0xff]  ;;  %v1307_v47 = vpack.c.bf16 %v243_v38, %v234_v37  ;;  %857 = vperm.xlu0 %1453, %v1096_v39   ;;  %v306_v31 = vld [vmem:[#allocation5 + $0x6e8] sm:$0xff]  ;;  %v1085_v37 = vld [vmem:[%s1832_s2 + $0x20] sm:$0xff] }
  0x9b   :  { %866 = vperm.xlu1 %1454, %v1097_v43   ;;  %v308_v39 = vld [vmem:[#allocation5 + $0x6f8] sm:$0xff]  ;;  %v314_v43 = vld [vmem:[#allocation5 + $0x728] sm:$0xff]  ;;  %v1089_v1 = vld [vmem:[%s1832_s2 + $0x60] sm:$0xff] }
  0x9c   :  { %1350 = vmatpush1.bf16.msra.mxu1 %v1349_v46  ;;  %v245_v46 = vld [vmem:[#allocation5 + $0x500] sm:$0xff] }
  0x9d   :  { %1352 = vmatprep.subr.bf16.mxu1 %v1351_v49  ;;  %1290 = vmatpush1.bf16.msra.mxu0 %v1289_v52  ;;  %v242_v49 = vld [vmem:[#allocation5 + $0x4e8] sm:$0xff]  ;;  %v261_v52 = vld [vmem:[#allocation5 + $0x580] sm:$0xff]  ;;  %v1371_v54 = vpack.c.bf16 %v245_v46, %v236_v45  ;;  %v324_v45 = vld [vmem:[#allocation5 + $0x778] sm:$0xff] }
  0x9e   :  { %1292 = vmatprep.subr.bf16.mxu0 %v1291_v55  ;;  %v235_v55 = vld [vmem:[#allocation5 + $0x4b0] sm:$0xff]  ;;  %875 = vperm.xlu0 %1453, %v1098_v53   ;;  %v333_v46 = vld [vmem:[#allocation5 + $0x7c0] sm:$0xff]  ;;  %v326_v53 = vld [vmem:[#allocation5 + $0x788] sm:$0xff] }
  0x9f   :  { %884 = vperm.xlu1 %1454, %v1099_v57   ;;  %v332_v57 = vld [vmem:[#allocation5 + $0x7b8] sm:$0xff] }
  0xa0   :  { %1354 = vmatpush1.bf16.msra.mxu1 %v1353_v58  ;;  %v1309_v58 = vpack.c.bf16 %v242_v49, %v233_v48  ;;  %v307_v49 = vld [vmem:[#allocation5 + $0x6f0] sm:$0xff] }
  0xa1   :  { %1356 = vmatprep.subr.bf16.mxu1 %v1355_v61  ;;  %1294 = vmatpush1.bf16.msra.mxu0 %v1293_v0  ;;  %v1311_v61 = vpack.c.bf16 %v261_v52, %v252_v51  ;;  %v1373_v0 = vpack.c.bf16 %v244_v56, %v235_v55  ;;  %v1087_v51 = vld [vmem:[%s1832_s2 + $0x40] sm:$0xff]  ;;  %v1325_v52 = vpack.c.bf16 %v314_v43, %v305_v42  ;;  %v282_v42 = vld [vmem:[#allocation5 + $0x628] sm:$0xff]  ;;  %v1611_v43 = vmov 0.0  }
  0xa2   :  { %1296 = vmatprep.subr.bf16.mxu0 %v1295_v3  ;;  %v1100_v3 = vld [vmem:[%s1832_s2 + $0x78] sm:$0xff]  ;;  %v1327_v55 = vpack.c.bf16 %v333_v46, %v324_v45  ;;  %v323_v56 = vld [vmem:[#allocation5 + $0x770] sm:$0xff]  ;;  %v129_v46 = vld [vmem:[#allocation5 + $0x160] sm:$0xff] }
  0xa3   :  { %893 = vperm.xlu0 %1453, %v1100_v3   ;;  %902 = vperm.xlu1 %1454, %v1101_v7   ;;  %v1329_v2 = vpack.c.bf16 %v332_v57, %v323_v56  ;;  %v344_v3 = vld [vmem:[#allocation5 + $0x818] sm:$0xff]  ;;  %v350_v7 = vld [vmem:[#allocation5 + $0x848] sm:$0xff] }
  0xa4   :  { %1358 = vmatpush1.bf16.msra.mxu1 %v1357_v6  ;;  %v262_v6 = vld [vmem:[#allocation5 + $0x588] sm:$0xff] }
  0xa5   :  { %1360 = vmatprep.subr.bf16.mxu1 %v1359_v9  ;;  %1298 = vmatpush1.bf16.msra.mxu0 %v1297_v13  ;;  %v272_v9 = vld [vmem:[#allocation5 + $0x5d8] sm:$0xff]  ;;  %v269_v13 = vld [vmem:[#allocation5 + $0x5c0] sm:$0xff]  ;;  %v1377_v16 = vpack.c.bf16 %v262_v6, %v253_v5  ;;  %v1331_v5 = vpack.c.bf16 %v351_v60, %v342_v59  ;;  %v174_v59 = vld [vmem:[#allocation5 + $0x2c8] sm:$0xff]  ;;  %v1612_v60 = vmov 1966171168  }
  0xa6   :  { %1300 = vmatprep.subr.bf16.mxu0 %v1299_v18  ;;  %v297_v18 = vld [vmem:[#allocation5 + $0x6a0] sm:$0xff]  ;;  %v1379_v20 = vpack.c.bf16 %v281_v10, %v272_v9  ;;  %v1317_v24 = vpack.c.bf16 %v278_v15, %v269_v13  ;;  %v360_v9 = vld [vmem:[#allocation5 + $0x898] sm:$0xff]  ;;  %v343_v15 = vld [vmem:[#allocation5 + $0x810] sm:$0xff] }
  0xa7   :  { %v1319_v27 = vpack.c.bf16 %v297_v18, %v288_v17  ;;  %742 = vperm.xlu0 %1453, %v739_v19   ;;  %736 = vperm.xlu1 %1454, %v733_v23   ;;  %v341_v6 = vld [vmem:[#allocation5 + $0x800] sm:$0xff]  ;;  %v1091_v17 = vld [vmem:[%s1832_s2 + $0x80] sm:$0xff]  ;;  %v362_v19 = vld [vmem:[#allocation5 + $0x8a8] sm:$0xff] }
  0xa8   :  { %1362 = vmatpush1.bf16.msra.mxu1 %v1361_v22  ;;  %v280_v22 = vld [vmem:[#allocation5 + $0x618] sm:$0xff]  ;;  %v369_v10 = vld [vmem:[#allocation5 + $0x8e0] sm:$0xff]  ;;  %v1333_v18 = vpack.c.bf16 %v350_v7, %v341_v6  ;;  %v183_v7 = vld [vmem:[#allocation5 + $0x310] sm:$0xff] }
  0xa9   :  { %1364 = vmatprep.subr.bf16.mxu1 %v1363_v25  ;;  %1302 = vmatpush1.bf16.msra.mxu0 %v1301_v29  ;;  %v290_v25 = vld [vmem:[#allocation5 + $0x668] sm:$0xff]  ;;  %v296_v29 = vld [vmem:[#allocation5 + $0x698] sm:$0xff]  ;;  %v1381_v30 = vpack.c.bf16 %v280_v22, %v271_v21  ;;  %v1335_v21 = vpack.c.bf16 %v369_v10, %v360_v9  ;;  %v359_v22 = vld [vmem:[#allocation5 + $0x890] sm:$0xff] }
  0xaa   :  { %1304 = vmatprep.subr.bf16.mxu0 %v1303_v32  ;;  %v315_v32 = vld [vmem:[#allocation5 + $0x730] sm:$0xff]  ;;  %v1383_v34 = vpack.c.bf16 %v299_v26, %v290_v25  ;;  %v1321_v38 = vpack.c.bf16 %v296_v29, %v287_v28  ;;  %v368_v23 = vld [vmem:[#allocation5 + $0x8d8] sm:$0xff]  ;;  %v237_v25 = vld [vmem:[#allocation5 + $0x4c0] sm:$0xff] }
  0xab   :  { %v1323_v41 = vpack.c.bf16 %v315_v32, %v306_v31  ;;  %751 = vperm.xlu0 %1453, %v1084_v33   ;;  %760 = vperm.xlu1 %1454, %v1085_v37   ;;  %v246_v26 = vld [vmem:[#allocation5 + $0x508] sm:$0xff]  ;;  %v361_v28 = vld [vmem:[#allocation5 + $0x8a0] sm:$0xff] }
  0xac   :  { %1366 = vmatpush1.bf16.msra.mxu1 %v1365_v36  ;;  %v298_v36 = vld [vmem:[#allocation5 + $0x6a8] sm:$0xff]  ;;  %v1403_v31 = vpack.c.bf16 %v246_v26, %v237_v25  ;;  %v93_v32 = vld [vmem:[#allocation5 + $0x40] sm:$0xff]  ;;  %v219_v25 = vld [vmem:[#allocation5 + $0x430] sm:$0xff] }
  0xad   :  { %1368 = vmatprep.subr.bf16.mxu1 %v1367_v40  ;;  %1306 = vmatpush1.bf16.msra.mxu0 %v1305_v44  ;;  %v317_v40 = vld [vmem:[#allocation5 + $0x740] sm:$0xff]  ;;  %v1385_v44 = vpack.c.bf16 %v298_v36, %v289_v35  ;;  %v370_v29 = vld [vmem:[#allocation5 + $0x8e8] sm:$0xff]  ;;  %v255_v35 = vld [vmem:[#allocation5 + $0x550] sm:$0xff] }
  0xae   :  { %1308 = vmatprep.subr.bf16.mxu0 %v1307_v47  ;;  %v1086_v47 = vld [vmem:[%s1832_s2 + $0x30] sm:$0xff]  ;;  %v1387_v48 = vpack.c.bf16 %v317_v40, %v308_v39  ;;  %v102_v33 = vld [vmem:[#allocation5 + $0x88] sm:$0xff]  ;;  %v264_v36 = vld [vmem:[#allocation5 + $0x598] sm:$0xff] }
  0xaf   :  { %769 = vperm.xlu0 %1453, %v1086_v47   ;;  %778 = vperm.xlu1 %1454, %v1087_v51   ;;  %v1405_v37 = vpack.c.bf16 %v102_v33, %v93_v32  ;;  %v111_v39 = vld [vmem:[#allocation5 + $0xd0] sm:$0xff]  ;;  %v120_v40 = vld [vmem:[#allocation5 + $0x118] sm:$0xff]  ;;  %v138_v47 = vld [vmem:[#allocation5 + $0x1a8] sm:$0xff] }
  0xb0   :  { %1370 = vmatpush1.bf16.msra.mxu1 %v1369_v50  ;;  %v316_v50 = vld [vmem:[#allocation5 + $0x738] sm:$0xff]  ;;  %v920_v51 = vld [vmem:[%s1835_s5] sm:$0xff]  ;;  %s1614_s5 = smov [#allocation11]  }
  0xb1   :  { %1372 = vmatprep.subr.bf16.mxu1 %v1371_v54  ;;  %1310 = vmatpush1.bf16.msra.mxu0 %v1309_v58  ;;  %v335_v54 = vld [vmem:[#allocation5 + $0x7d0] sm:$0xff]  ;;  %v1389_v58 = vpack.c.bf16 %v316_v50, %v307_v49  ;;  %v300_v49 = vld [vmem:[#allocation5 + $0x6b8] sm:$0xff]  ;;  %v1413_v50 = vpack.c.bf16 %v138_v47, %v129_v46  ;;  %s1066_s29 = sshll.u32 %s1614_s5, 4  ;;  %s1067_s29 = int_to_ptr.vmem [resolvable:$true] %s1066_s29 }
  0xb2   :  { %1312 = vmatprep.subr.bf16.mxu0 %v1311_v61  ;;  %v1088_v61 = vld [vmem:[%s1832_s2 + $0x50] sm:$0xff]  ;;  %v1391_v62 = vpack.c.bf16 %v335_v54, %v326_v53  ;;  %v147_v53 = vld [vmem:[#allocation5 + $0x1f0] sm:$0xff]  ;;  %v156_v54 = vld [vmem:[#allocation5 + $0x238] sm:$0xff]  ;;  %s1546_s1 = scalar_lea.vmem %s1067_s29, 32  ;;  %p1551_p5 = scmp.lt.s32.totalorder %s1067_s29, %s1067_s29 }
  0xb3   :  { %787 = vperm.xlu0 %1453, %v1088_v61   ;;  %796 = vperm.xlu1 %1454, %v1089_v1   ;;  %v1417_v56 = vpack.c.bf16 %v156_v54, %v147_v53  ;;  %v932_v61 = vunpack.c.l.s4 %v1612_v60  ;;  %v228_v26 = vld [vmem:[#allocation5 + $0x478] sm:$0xff]  ;;  %p1547_p4 = scmp.ne.s32.totalorder %s1067_s29, %s1546_s1  ;;  %p1552_p6 = scmp.lt.s32.totalorder %s1546_s1, %s1546_s1 }
  0xb4   :  { %1374 = vmatpush1.bf16.msra.mxu1 %v1373_v0  ;;  %v334_v0 = vld [vmem:[#allocation5 + $0x7c8] sm:$0xff] }
  0xb5   :  { %1376 = vmatprep.subr.bf16.mxu1 %v1375_v4  ;;  %1314 = vmatpush1.bf16.msra.mxu0 %v1313_v8  ;;  %v353_v4 = vld [vmem:[#allocation5 + $0x860] sm:$0xff]  ;;  %v1393_v8 = vpack.c.bf16 %v334_v0, %v325_v63  ;;  %v327_v63 = vld [vmem:[#allocation5 + $0x790] sm:$0xff]  ;;  %v336_v0 = vld [vmem:[#allocation5 + $0x7d8] sm:$0xff]  ;;  %v933_v1 = vunpack.c.0.s8 %v932_v61  ;;  %p1553_p7 = por %p1552_p6, %p1551_p5 }
  0xb6   :  { %1316 = vmatprep.subr.bf16.mxu0 %v1315_v12  ;;  %v1090_v12 = vld [vmem:[%s1832_s2 + $0x70] sm:$0xff]  ;;  %v1395_v13 = vpack.c.bf16 %v353_v4, %v344_v3  ;;  %v1423_v6 = vpack.c.bf16 %v336_v0, %v327_v63 }
  0xb7   :  { %805 = vperm.xlu0 %1453, %v1090_v12   ;;  %814 = vperm.xlu1 %1454, %v1091_v17   ;;  %v918_v4 = vld [vmem:[#allocation7] sm:$0x1]  ;;  %p1554_p8 = pnand %p1553_p7, %p1547_p4 }
  0xb8   :  { %1378 = vmatpush1.bf16.msra.mxu1 %v1377_v16  ;;  %v352_v16 = vld [vmem:[#allocation5 + $0x858] sm:$0xff]  ;;  %v345_v12 = vld [vmem:[#allocation5 + $0x820] sm:$0xff] }
  0xb9   :  { %1380 = vmatprep.subr.bf16.mxu1 %v1379_v20  ;;  %1318 = vmatpush1.bf16.msra.mxu0 %v1317_v24  ;;  %v371_v20 = vld [vmem:[#allocation5 + $0x8f0] sm:$0xff]  ;;  %v1397_v24 = vpack.c.bf16 %v352_v16, %v343_v15 }
  0xba   :  { %1320 = vmatprep.subr.bf16.mxu0 %v1319_v27  ;;  %v1399_v27 = vpack.c.bf16 %v371_v20, %v362_v19  ;;  %v210_v19 = vld [vmem:[#allocation5 + $0x3e8] sm:$0xff] }
  0xbc   :  { %1382 = vmatpush1.bf16.msra.mxu1 %v1381_v30  ;;  %v1337_v30 = vpack.c.bf16 %v368_v23, %v359_v22  ;;  %v372_v22 = vld [vmem:[#allocation5 + $0x8f8] sm:$0xff] }
  0xbd   :  { %1384 = vmatprep.subr.bf16.mxu1 %v1383_v34  ;;  %1322 = vmatpush1.bf16.msra.mxu0 %v1321_v38  ;;  %v1401_v34 = vpack.c.bf16 %v370_v29, %v361_v28  ;;  %v1407_v38 = vpack.c.bf16 %v264_v36, %v255_v35 }
  0xbe   :  { %1324 = vmatprep.subr.bf16.mxu0 %v1323_v41  ;;  %v273_v41 = vld [vmem:[#allocation5 + $0x5e0] sm:$0xff] }
  0xbf   :  { %v1411_v45 = vpack.c.bf16 %v282_v42, %v273_v41 }
  0xc0   :  { %1386 = vmatpush1.bf16.msra.mxu1 %v1385_v44  ;;  %v1409_v44 = vpack.c.bf16 %v120_v40, %v111_v39 }
  0xc1   :  { %1388 = vmatprep.subr.bf16.mxu1 %v1387_v48  ;;  %1326 = vmatpush1.bf16.msra.mxu0 %v1325_v52  ;;  %v291_v48 = vld [vmem:[#allocation5 + $0x670] sm:$0xff] }
  0xc2   :  { %1328 = vmatprep.subr.bf16.mxu0 %v1327_v55  ;;  %v1415_v52 = vpack.c.bf16 %v300_v49, %v291_v48  ;;  %v318_v55 = vld [vmem:[#allocation5 + $0x748] sm:$0xff] }
  0xc4   :  { %1390 = vmatpush1.bf16.msra.mxu1 %v1389_v58  ;;  %v165_v58 = vld [vmem:[#allocation5 + $0x280] sm:$0xff] }
  0xc5   :  { %1392 = vmatprep.subr.bf16.mxu1 %v1391_v62  ;;  %1330 = vmatpush1.bf16.msra.mxu0 %v1329_v2  ;;  %v934_v62 = vlaneseq  ;;  %v1421_v3 = vpack.c.bf16 %v174_v59, %v165_v58 }
  0xc6   :  { %1332 = vmatprep.subr.bf16.mxu0 %v1331_v5  ;;  %v919_v5 = vld [vmem:[#allocation7 + $0x1] sm:$0x1] }
  0xc7   :  { %v935_v2 = vshrl.u32 %v934_v62, 7  ;;  %v930_v9 = vcombine.low %v918_v4, %v919_v5 }
  0xc8   :  { %1394 = vmatpush1.bf16.msra.mxu1 %v1393_v8  ;;  %v192_v8 = vld [vmem:[#allocation5 + $0x358] sm:$0xff] }
  0xc9   :  { %1396 = vmatprep.subr.bf16.mxu1 %v1395_v13  ;;  %1334 = vmatpush1.bf16.msra.mxu0 %v1333_v18  ;;  %v1791_v10 = vsub.s32 %v933_v1, %v935_v2  ;;  %v354_v13 = vld [vmem:[#allocation5 + $0x868] sm:$0xff]  ;;  %v1425_v16 = vpack.c.bf16 %v192_v8, %v183_v7  ;;  %v201_v18 = vld [vmem:[#allocation5 + $0x3a0] sm:$0xff] }
  0xca   :  { %1336 = vmatprep.subr.bf16.mxu0 %v1335_v21  ;;  %v1427_v17 = vpack.c.bf16 %v354_v13, %v345_v12  ;;  %v363_v21 = vld [vmem:[#allocation5 + $0x8b0] sm:$0xff]  ;;  %v1429_v23 = vpack.c.bf16 %v210_v19, %v201_v18 }
  0xcb   :  { %v937_v15 = vrot.slane %v930_v9, %v1791_v10 }
  0xcc   :  { %1398 = vmatpush1.bf16.msra.mxu1 %v1397_v24  ;;  %v1431_v24 = vpack.c.bf16 %v372_v22, %v363_v21 }
  0xcd   :  { %1400 = vmatprep.subr.bf16.mxu1 %v1399_v27  ;;  %1338 = vmatpush1.bf16.msra.mxu0 %v1337_v30  ;;  %v944_v20 = vrot.slane %v937_v15, %v1791_v10  ;;  %v1433_v27 = vpack.c.bf16 %v228_v26, %v219_v25 }
  0xce   :  { %1404 = vmatprep.subr.bf16.mxu0 %v1403_v31 }
  0xd0   :  { %1402 = vmatpush1.bf16.msra.mxu1 %v1401_v34  ;;  %586 = vmatmul.mubr.f32.vlgmr.msra.gmra.mrb[2].mxu0 %v1718_v11 }
  0xd1   :  { %1142 = vmatprep.subr.mxu1 %v1611_v43  ;;  %1406 = vmatpush3.bf16.msra.mxu0 %v1405_v37 }
  0xd2   :  { %727 = vmatprep.mubr.f32.mxu0 %v1714_v14  ;;  %1408 = vmatprep.subr.bf16.mxu0 %v1407_v38  ;;  %v309_v14 = vld [vmem:[#allocation5 + $0x700] sm:$0xff] }
  0xd3   :  { %657 = vmatmul.mubr.f32.vlgmr.msra.gmra.mrb[2].mxu1 %v1718_v11  ;;  %v1419_v57 = vpack.c.bf16 %v318_v55, %v309_v14 }
  0xd4   :  { %1144 = vmatprep.mubr.msk.f32.mxu1 %vm1613_vm1, %v1611_v43 }
  0xd5   :  { %1410 = vmatpush3.bf16.msra.mxu0 %v1409_v44 }
  0xd6   :  { %1412 = vmatprep.subr.bf16.mxu0 %v1411_v45 }
  0xd9   :  { %1143 = vmatpush3.xpose.msk.msra.mxu1 %vm945_vm0, %v920_v51  ;;  %1414 = vmatpush3.bf16.msra.mxu0 %v1413_v50 }
  0xda   :  { %1416 = vmatprep.subr.bf16.mxu0 %v1415_v52 }
  0xdc   :  { %1145 = vmatmul.mubr.msk.f32.vlgmr.msra.gmra.mrb[4].mxu1 %vm945_vm0, %v944_v20 }
  0xdd   :  { %1418 = vmatpush3.bf16.msra.mxu0 %v1417_v56 }
  0xde   :  { %1420 = vmatprep.subr.bf16.mxu0 %v1419_v57 }
  0xe1   :  { %1422 = vmatpush3.bf16.msra.mxu0 %v1421_v3 }
  0xe2   :  { %1424 = vmatprep.subr.bf16.mxu0 %v1423_v6 }
  0xe5   :  { %1426 = vmatpush3.bf16.msra.mxu0 %v1425_v16 }
  0xe6   :  { %1428 = vmatprep.subr.bf16.mxu0 %v1427_v17 }
  0xe9   :  { %1430 = vmatpush3.bf16.msra.mxu0 %v1429_v23 }
  0xea   :  { %1432 = vmatprep.subr.bf16.mxu0 %v1431_v24  ;;  %v1102_v24 = vld [vmem:[#allocation8] ss:$0 sm:$0xff] }
  0xed   :  { %1434 = vmatpush3.bf16.msra.mxu0 %v1433_v27 }
  0xf0   :  { %728 = vmatmul.mubr.f32.vlgmr.msra.gmra.mrb[4].mxu0 %v1718_v11 }
 0x106   :  { %v840_v29 = vpop.permute.xlu1 %839 }
 0x109   :  { %v831_v28 = vpop.permute.xlu0 %830 }
 0x10b   :  { %v849_v31 = vpop.permute.xlu1 %848 }
 0x115   :  { %v824_v30 = vpop.permute.xlu0 %823 }
 0x119   :  { %v858_v32 = vpop.permute.xlu0 %857 }
 0x11a   :  { %v867_v33 = vpop.permute.xlu1 %866 }
 0x11d   :  { %v876_v34 = vpop.permute.xlu0 %875 }
 0x11e   :  { %v885_v35 = vpop.permute.xlu1 %884 }
 0x122   :  { %v894_v36 = vpop.permute.xlu0 %893  ;;  %v1797_v37 = vpop.permute.xlu1 %902 }
 0x126   :  { %v743_v38 = vpop.permute.xlu0 %742  ;;  %v737_v39 = vpop.permute.xlu1 %736 }
 0x12a   :  { %v752_v40 = vpop.permute.xlu0 %751  ;;  %v761_v42 = vpop.permute.xlu1 %760 }
 0x12e   :  { %v770_v48 = vpop.permute.xlu0 %769  ;;  %v779_v61 = vpop.permute.xlu1 %778 }
 0x132   :  { %v788_v62 = vpop.permute.xlu0 %787  ;;  %v797_v0 = vpop.permute.xlu1 %796 }
 0x136   :  { %v806_v7 = vpop.permute.xlu0 %805 }
 0x163   :  { %v445_v41 = vpop.f32.mrb[0].mxu0 }
 0x164   :  { %v745_v43 = vmul.f32 %v743_v38, %v445_v41  ;;  %v833_v44 = vmul.f32 %v831_v28, %v445_v41  ;;  %v447_v45 = vpop.f32.mrb[1].mxu0 }
 0x165   :  { %v754_v11 = vmul.f32 %v752_v40, %v447_v45  ;;  %v842_v46 = vmul.f32 %v840_v29, %v447_v45 }
 0x166   :  { %v516_v47 = vpop.f32.mrb[0].mxu1  ;;  %v746_v49 = vadd.f32 %v745_v43, %v737_v39  ;;  %v834_v50 = vadd.f32 %v833_v44, %v824_v30 }
 0x167   :  { %v763_v51 = vmul.f32 %v761_v42, %v516_v47  ;;  %v851_v52 = vmul.f32 %v849_v31, %v516_v47  ;;  %v518_v53 = vpop.f32.mrb[1].mxu1 }
 0x168   :  { %v755_v54 = vadd.f32 %v754_v11, %v746_v49  ;;  %v843_v14 = vadd.f32 %v842_v46, %v834_v50  ;;  %v772_v55 = vmul.f32 %v770_v48, %v518_v53  ;;  %v860_v56 = vmul.f32 %v858_v32, %v518_v53 }
 0x16a   :  { %v764_v57 = vadd.f32 %v763_v51, %v755_v54  ;;  %v852_v58 = vadd.f32 %v851_v52, %v843_v14 }
 0x16c   :  { %v773_v59 = vadd.f32 %v772_v55, %v764_v57  ;;  %v861_v60 = vadd.f32 %v860_v56, %v852_v58 }
 0x1a3   :  { %v587_v63 = vpop.f32.mrb[2].mxu0 }
 0x1a4   :  { %v781_v1 = vmul.f32 %v779_v61, %v587_v63  ;;  %v869_v2 = vmul.f32 %v867_v33, %v587_v63  ;;  %v589_v3 = vpop.f32.mrb[3].mxu0 }
 0x1a5   :  { %v790_v4 = vmul.f32 %v788_v62, %v589_v3  ;;  %v878_v5 = vmul.f32 %v876_v34, %v589_v3 }
 0x1a6   :  { %v658_v6 = vpop.f32.mrb[2].mxu1  ;;  %v782_v8 = vadd.f32 %v781_v1, %v773_v59  ;;  %v870_v9 = vadd.f32 %v869_v2, %v861_v60 }
 0x1a7   :  { %v799_v12 = vmul.f32 %v797_v0, %v658_v6  ;;  %v887_v13 = vmul.f32 %v885_v35, %v658_v6  ;;  %v660_v15 = vpop.f32.mrb[3].mxu1 }
 0x1a8   :  { %v791_v16 = vadd.f32 %v790_v4, %v782_v8  ;;  %v879_v17 = vadd.f32 %v878_v5, %v870_v9  ;;  %v808_v18 = vmul.f32 %v806_v7, %v660_v15  ;;  %v896_v19 = vmul.f32 %v894_v36, %v660_v15 }
 0x1aa   :  { %v800_v20 = vadd.f32 %v799_v12, %v791_v16  ;;  %v888_v21 = vadd.f32 %v887_v13, %v879_v17 }
 0x1ac   :  { %v809_v22 = vadd.f32 %v808_v18, %v800_v20  ;;  %v897_v23 = vadd.f32 %v896_v19, %v888_v21 }
 0x1af   :  { %v1017_v25 = vpop.f32.mrb[4].mxu1 }
 0x1b0   :  { %v1018_v26 = vadd.f32 %v1102_v24, %v1017_v25  ;;  %v1146_v27 = vpop.f32.mrb[5].mxu1 }
 0x1b2   :  { %v1028_v28 = vrot.slane %v1018_v26, %v1791_v10 }
 0x1b4   :  { %v1029_v29 = vcombine.high %v1028_v28, %v1028_v28  ;;  %v1036_v30 = vrot.slane %v1028_v28, %v1791_v10 }
 0x1b6   :  { %v1043_v31 = vrot.slane %v1029_v29, %v1791_v10  ;;  %1047 = vst.msk [vmem:[#allocation11] sm:$0x1] %vm1046_vm2, %v1036_v30 }
 0x1b8   :  { %1048 = vst.msk [vmem:[#allocation11 + $0x1] sm:$0x1] %vm1046_vm2, %v1043_v31 }
 0x1c3   :  { %v1137_v32 = vpop.f32.mrb[4].mxu0 }
 0x1c4   :  { %1557 = shalt.err (!%p1554_p8)
}
 0x1c5   :  { %s1558_s9 = scalar_lea.hbm %s1838_s8, 32 }
 0x1c6   :  { %p1559_p9 = scmp.ne.s32.totalorder %s1838_s8, %s1558_s9  ;;  %p1562_p10 = scmp.lt.u32.totalorder %s1558_s9, %s1838_s8 }
 0x1c8   :  { %p1564_p11 = pnand %p1562_p10, %p1559_p9 }
 0x1ca   :  { %1567 = shalt.err (!%p1564_p11)
}
 0x1cb   :  { %1072 = dma.vmem_to_hbm [thread:$0]  %s1067_s29, 32, %s1838_s8, [#allocation12], %s1607_s0, %s1607_s0, %s1608_s20   ;;  %v1138_v10 = vpop.f32.mrb[5].mxu0  ;;  %v815_v34 = vpop.permute.xlu1 %814  ;;  %vm911_vm3 = vcmask 523264  }
 0x1cc   :  { %v1139_v33 = vadd.f32 %v1138_v10, %v1137_v32  ;;  %s1615_s13 = smov 64   ;;  %s1616_s14 = smov [#allocation10]  }
 0x1cd   :  { %s1054_s15 = sshll.u32 %s1616_s14, 4  ;;  %s1055_s15 = int_to_ptr.vmem [resolvable:$true] %s1054_s15 }
 0x1ce   :  { %v817_v35 = vmul.f32 %v1139_v33, %v815_v34  ;;  %v905_v36 = vmul.f32 %v1139_v33, %v1797_v37  ;;  %s1568_s8 = scalar_lea.vmem %s1055_s15, 128  ;;  %p1573_p13 = scmp.lt.s32.totalorder %s1055_s15, %s1055_s15 }
 0x1cf   :  { %p1569_p12 = scmp.ne.s32.totalorder %s1055_s15, %s1568_s8  ;;  %p1574_p0 = scmp.lt.s32.totalorder %s1568_s8, %s1568_s8 }
 0x1d0   :  { %v818_v38 = vadd.f32 %v817_v35, %v809_v22  ;;  %v906_v39 = vadd.f32 %v905_v36, %v897_v23 }
 0x1d1   :  { %p1575_p1 = por %p1574_p0, %p1573_p13 }
 0x1d2   :  { %908 = vrot.lane.b32.xlu0 %v906_v39, %s1615_s13 }
 0x1d3   :  { %p1576_p2 = pnand %p1575_p1, %p1569_p12 }
 0x244   :  { %v909_v40 = vpop.permute.xlu0 %908 }
 0x245   :  { %v912_v41 = vsel %vm911_vm3, %v818_v38, %v909_v40 }
 0x246   :  { %v914_v42 = vcombine.high %v912_v41, %v912_v41  ;;  %916 = vst [vmem:[#allocation10] sm:$0xf] %v912_v41 }
 0x248   :  { %917 = vst [vmem:[#allocation10 + $0x4] sm:$0xf] %v914_v42 }
 0x249   :  { %1579 = shalt.err (!%p1576_p2)
}
 0x24a   :  { %s1580_s16 = scalar_lea.hbm %s1837_s7, 128 }
 0x24b   :  { %p1581_p3 = scmp.ne.s32.totalorder %s1837_s7, %s1580_s16  ;;  %p1584_p4 = scmp.lt.u32.totalorder %s1580_s16, %s1837_s7 }
 0x24d   :  { %p1586_p5 = pnand %p1584_p4, %p1581_p3 }
 0x24f   :  { %1589 = shalt.err (!%p1586_p5)
}
 0x250   :  { %s1617_s22 = smov 4  }
 0x251   :  { %1060 = dma.vmem_to_hbm [thread:$0]  %s1055_s15, 128, %s1837_s7, [#allocation4], %s1615_s13, %s1615_s13, %s1617_s22  }
 0x252   :  { %1596 = dma.done.wait [#allocation4], 128  }
 0x253   :  { %1597 = vsyncadd [#allocation4], 4294967168 }
 0x254   :  { %1598 = dma.done.wait [#allocation12], 32  }
 0x255   :  { %1599 = vsyncadd [#allocation12], 4294967264 }
 0x256   :  { %1079 = vsyncpa [#allocation3], 1 }
 0x257   :  { %1080 = vsyncpa [#allocation6], 1 }
 0x258   :  { %1081 = vsyncpa [#allocation9], 1 }
 0x259   :  { %1082 = vsyncpa [#allocation4], 1 }
 0x25a   :  { %1083 = vsyncpa [#allocation12], 1 }

</bundles_post_ra>
